<compile_context>
chip_gen: v7x
topology: tpu7x:2x2x1
jax: 0.10.0
libtpu: 0.0.40
codegen_flags: <defaults>
</compile_context>

<pallas_src>
import jax
import jax.numpy as jnp
from jax.experimental import pallas as pl
from jax.experimental.pallas import tpu as pltpu

EPS = 1e-5
LANES = 128


def _vmem_capacity_bytes():
    try:
        return int(pltpu.get_tpu_info().vmem_capacity_bytes)
    except Exception:
        return 64 * 1024 * 1024  # conservative (v7x-sized) fallback


_VMEM_CAP = _vmem_capacity_bytes()


def _round_up(x, m):
    return (x + m - 1) // m * m


def _pick_tm(m, target):
    """Largest divisor of m that is <= target and a multiple of 8; m itself as fallback."""
    if m <= target:
        return m
    best = 0
    d = 1
    while d * d <= m:
        if m % d == 0:
            for cand in (d, m // d):
                if cand <= target and cand % 8 == 0 and cand > best:
                    best = cand
        d += 1
    return best if best > 0 else m


# Row/column combination matrices folding the nearest-2x upsample into the 3x3 kernel.
# Phase a==0 taps x[i-1], x[i]; phase a==1 taps x[i], x[i+1] (same for columns / b).
_PHASE_COMBINE = jnp.array(
    [[[1.0, 0.0, 0.0], [0.0, 1.0, 1.0]],
     [[1.0, 1.0, 0.0], [0.0, 0.0, 1.0]]], dtype=jnp.float32)


def _conv_stats_kernel(x_ref, w_ref, y_ref, st_ref):
    """Pass 1: conv matmul (bf16 MXU, f32 acc) + per-tile BN partial statistics.

    x_ref : (TM, K)  bf16 phase-im2col rows
    w_ref : (K, Cp)  bf16 phase-effective weights (Cout zero-padded to Cp lanes)
    y_ref : (TM, Cp) bf16 conv output tile
    st_ref: (2, Cp)  f32 rows = [channel sum, tile-centered sum of squares]
    """
    y = jnp.dot(x_ref[...], w_ref[...], preferred_element_type=jnp.float32)
    y_ref[...] = y.astype(y_ref.dtype)
    s = jnp.sum(y, axis=0, keepdims=True)                        # (1, Cp)
    tile_mean = s * (1.0 / y.shape[0])
    css = jnp.sum((y - tile_mean) ** 2, axis=0, keepdims=True)   # (1, Cp)
    st_ref[...] = jnp.concatenate([s, css], axis=0)


def _norm_relu_kernel(y_ref, scale_ref, shift_ref, o_ref):
    """Pass 2: folded BatchNorm affine (precomputed scale/shift) + ReLU, in f32."""
    y = y_ref[...].astype(jnp.float32)
    o_ref[...] = jnp.maximum(y * scale_ref[...] + shift_ref[...], 0.0)


@jax.jit
def upconv_forward(x_nchw, w, b, gamma, beta):
    """x_nchw: (N, Cin, H, W) -> (N, Cout, 2H, 2W). Matches PyTorch UpConv.forward."""
    del b  # Conv bias is exactly cancelled by training-mode BatchNorm mean subtraction.
    N, Cin, H, W = x_nchw.shape
    Cout = w.shape[0]
    H2, W2 = 2 * H, 2 * W
    Mp = N * H * W                              # output rows per phase
    K = 4 * Cin                                 # 2x2 effective taps per phase
    Cp = _round_up(max(Cout, LANES), LANES)     # lane-dense output channels

    # ---- tile sizing / VMEM budget (generation-aware) ----
    budget = min(_VMEM_CAP // 2, 48 * 1024 * 1024)          # ~32 MiB v7x, 48 MiB v5e/v6e
    vmem_limit = int(min(_VMEM_CAP * 3 // 4, 96 * 1024 * 1024))
    # bytes per tile row, double-buffered: x (bf16) + y (bf16); weights resident (2 bufs).
    row_bytes = 2 * 2 * K + 2 * 2 * Cp
    tm_target = max(128, (budget - 4 * K * Cp) // row_bytes)
    tm_target = min(tm_target, 2048)
    TM = _pick_tm(Mp, tm_target)
    num_tiles = Mp // TM

    # ---- glue: phase im2col on the ORIGINAL (un-upsampled) input ----
    x_nhwc = jnp.transpose(x_nchw, (0, 2, 3, 1)).astype(jnp.float32)    # (N,H,W,Cin)
    x_pad = jnp.pad(x_nhwc, ((0, 0), (1, 1), (1, 1), (0, 0)))           # (N,H+2,W+2,Cin)
    phase_cols = []
    for a in (0, 1):
        for c in (0, 1):
            taps = [x_pad[:, a + t:a + t + H, c + s:c + s + W, :]
                    for t in (0, 1) for s in (0, 1)]
            phase_cols.append(jnp.concatenate(taps, axis=-1).reshape(Mp, K))
    x_col = jnp.stack(phase_cols, axis=0).astype(jnp.bfloat16)          # (4, Mp, K)

    # ---- glue: phase-effective weights (fold kernel rows/cols per phase) ----
    w_k = jnp.transpose(w, (2, 3, 1, 0)).astype(jnp.float32)            # (ky,kx,Cin,Cout)
    w_eff = jnp.einsum('aty,bsx,yxio->abtsio', _PHASE_COMBINE, _PHASE_COMBINE, w_k)
    w_eff = w_eff.reshape(4, K, Cout)
    w_eff = jnp.pad(w_eff, ((0, 0), (0, 0), (0, Cp - Cout))).astype(jnp.bfloat16)

    # ---- pass 1: conv matmul + per-tile BN partial stats ----
    flops = 2 * 4 * Mp * K * Cp
    bytes_accessed = (4 * Mp * K * 2 + 4 * K * Cp * 2 + 4 * Mp * Cp * 2
                      + 4 * num_tiles * 2 * Cp * 4)
    y_flat, stats = pl.pallas_call(
        _conv_stats_kernel,
        out_shape=(jax.ShapeDtypeStruct((4, Mp, Cp), jnp.bfloat16),
                   jax.ShapeDtypeStruct((4, num_tiles, 2, Cp), jnp.float32)),
        grid=(4, num_tiles),
        in_specs=[
            pl.BlockSpec((None, TM, K), lambda ph, i: (ph, i, 0)),
            pl.BlockSpec((None, K, Cp), lambda ph, i: (ph, 0, 0)),
        ],
        out_specs=(
            pl.BlockSpec((None, TM, Cp), lambda ph, i: (ph, i, 0)),
            pl.BlockSpec((None, None, 2, Cp), lambda ph, i: (ph, i, 0, 0)),
        ),
        compiler_params=pltpu.CompilerParams(
            dimension_semantics=("parallel", "parallel"),
            vmem_limit_bytes=vmem_limit),
        cost_estimate=pl.CostEstimate(
            flops=flops, transcendentals=0, bytes_accessed=bytes_accessed),
    )(x_col, w_eff)

    # ---- glue: exact cross-tile BN statistics (Chan combine; all tiles equal size) ----
    Mtot = 4 * Mp                                   # == N * 2H * 2W
    sums = stats[:, :, 0, :]                        # (4, T, Cp)
    csss = stats[:, :, 1, :]
    mean = jnp.sum(sums, axis=(0, 1)) / Mtot
    tile_means = sums / TM
    var = (jnp.sum(csss, axis=(0, 1))
           + TM * jnp.sum((tile_means - mean) ** 2, axis=(0, 1))) / Mtot
    gamma_p = jnp.pad(gamma.astype(jnp.float32), (0, Cp - Cout))
    beta_p = jnp.pad(beta.astype(jnp.float32), (0, Cp - Cout))
    inv_std = jax.lax.rsqrt(var + EPS)
    scale = (gamma_p * inv_std).reshape(1, Cp)
    shift = (beta_p - mean * gamma_p * inv_std).reshape(1, Cp)

    # ---- pass 2: folded BN affine + ReLU ----
    out_phases = pl.pallas_call(
        _norm_relu_kernel,
        out_shape=jax.ShapeDtypeStruct((4, Mp, Cp), jnp.float32),
        grid=(4, num_tiles),
        in_specs=[
            pl.BlockSpec((None, TM, Cp), lambda ph, i: (ph, i, 0)),
            pl.BlockSpec((1, Cp), lambda ph, i: (0, 0)),
            pl.BlockSpec((1, Cp), lambda ph, i: (0, 0)),
        ],
        out_specs=pl.BlockSpec((None, TM, Cp), lambda ph, i: (ph, i, 0)),
        compiler_params=pltpu.CompilerParams(
            dimension_semantics=("parallel", "parallel"),
            vmem_limit_bytes=vmem_limit),
        cost_estimate=pl.CostEstimate(
            flops=3 * 4 * Mp * Cp, transcendentals=0,
            bytes_accessed=4 * Mp * Cp * 2 + 4 * Mp * Cp * 4 + 2 * Cp * 4),
    )(y_flat, scale, shift)

    # ---- glue: interleave the 4 phases back to (N, Cout, 2H, 2W) ----
    out = out_phases[:, :, :Cout].reshape(2, 2, N, H, W, Cout)   # (a, b, n, i, j, c)
    out = jnp.transpose(out, (2, 3, 0, 4, 1, 5)).reshape(N, H2, W2, Cout)
    return jnp.transpose(out, (0, 3, 1, 2))


def upconv_reference(x_nchw, w, b, gamma, beta):
    """Pure-JAX f32 reference matching PyTorch UpConv.forward (training-mode BN)."""
    x_up = jnp.repeat(jnp.repeat(x_nchw, 2, axis=2), 2, axis=3)
    y = jax.lax.conv_general_dilated(
        x_up.astype(jnp.float32), w.astype(jnp.float32),
        window_strides=(1, 1), padding=((1, 1), (1, 1)),
        dimension_numbers=("NCHW", "OIHW", "NCHW"))
    y = y + b.reshape(1, -1, 1, 1)
    mean = jnp.mean(y, axis=(0, 2, 3), keepdims=True)
    var = jnp.mean((y - mean) ** 2, axis=(0, 2, 3), keepdims=True)
    y = (y - mean) * jax.lax.rsqrt(var + EPS)
    y = y * gamma.reshape(1, -1, 1, 1) + beta.reshape(1, -1, 1, 1)
    return jnp.maximum(y, 0.0)


if __name__ == "__main__":
    N, Cin, H, W = 2, 4, 16, 16
    Cout = 8

    key = jax.random.PRNGKey(0)
    kx, kw, kb = jax.random.split(key, 3)

    x = jax.random.normal(kx, (N, Cin, H, W), dtype=jnp.float32)
    # Conv2d parameters (deterministic synthetic init).
    w = jax.random.normal(kw, (Cout, Cin, 3, 3), dtype=jnp.float32) * 0.1
    b = jax.random.normal(kb, (Cout,), dtype=jnp.float32) * 0.1
    # BatchNorm2d default affine init.
    gamma = jnp.ones((Cout,), dtype=jnp.float32)
    beta = jnp.zeros((Cout,), dtype=jnp.float32)

    out = jax.block_until_ready(upconv_forward(x, w, b, gamma, beta))
    ref = jax.block_until_ready(upconv_reference(x, w, b, gamma, beta))

    assert out.shape == (N, Cout, 2 * H, 2 * W), out.shape
    max_err = float(jnp.max(jnp.abs(out - ref)))
    # Tolerance sized for bf16 MXU operands (f32 accumulation, f32 BN statistics).
    assert max_err < 5e-2, max_err
    print("KERNEL_OK")
</pallas_src>

<mosaic_0001>
module attributes {stable_mosaic.version = 11 : i64} {
  func.func @_conv_stats_kernel(%arg0: i32, %arg1: i32, %arg2: memref<1x512x16xbf16, #tpu.memory_space<vmem>>, %arg3: memref<1x16x128xbf16, #tpu.memory_space<vmem>>, %arg4: memref<1x512x128xbf16, #tpu.memory_space<vmem>>, %arg5: memref<1x1x2x128xf32, #tpu.memory_space<vmem>>) attributes {dimension_semantics = [#tpu.dimension_semantics<parallel>, #tpu.dimension_semantics<parallel>], iteration_bounds = array<i64: 4, 1>, scalar_prefetch = 0 : i64, scratch_operands = 0 : i64, tpu.core_type = #tpu.core_type<tc>, window_params = [{transform_indices = @transform_0, window_bounds = array<i64: 1, 512, 16>}, {transform_indices = @transform_1, window_bounds = array<i64: 1, 16, 128>}, {transform_indices = @transform_2, window_bounds = array<i64: 1, 512, 128>}, {transform_indices = @transform_3, window_bounds = array<i64: 1, 1, 2, 128>}]} {
    %c0 = arith.constant 0 : index
    %c0_0 = arith.constant 0 : index
    %c0_1 = arith.constant 0 : index
    %0 = vector.load %arg2[%c0, %c0_0, %c0_1] : memref<1x512x16xbf16, #tpu.memory_space<vmem>>, vector<1x512x16xbf16>
    %1 = vector.shape_cast %0 : vector<1x512x16xbf16> to vector<512x16xbf16>
    %c0_2 = arith.constant 0 : index
    %c0_3 = arith.constant 0 : index
    %c0_4 = arith.constant 0 : index
    %2 = vector.load %arg3[%c0_2, %c0_3, %c0_4] : memref<1x16x128xbf16, #tpu.memory_space<vmem>>, vector<1x16x128xbf16>
    %3 = vector.shape_cast %2 : vector<1x16x128xbf16> to vector<16x128xbf16>
    %cst = arith.constant dense<0.000000e+00> : vector<512x128xf32>
    %4 = tpu.matmul %1, %3, %cst {dimension_numbers = #tpu.dot_dimension_numbers<[1], [0], [0], [1], [0, 0, 1, 1], [], []>} : vector<512x16xbf16>, vector<16x128xbf16>, vector<512x128xf32> -> vector<512x128xf32>
    %5 = arith.truncf %4 : vector<512x128xf32> to vector<512x128xbf16>
    %c0_5 = arith.constant 0 : index
    %c0_6 = arith.constant 0 : index
    %c0_7 = arith.constant 0 : index
    %6 = vector.load %arg4[%c0_5, %c0_6, %c0_7] : memref<1x512x128xbf16, #tpu.memory_space<vmem>>, vector<1x512x128xbf16>
    %7 = vector.shape_cast %6 : vector<1x512x128xbf16> to vector<512x128xbf16>
    %8 = vector.shape_cast %5 : vector<512x128xbf16> to vector<1x512x128xbf16>
    tpu.vector_store %arg4[%c0_5, %c0_6, %c0_7], %8 {strides = array<i32>} : memref<1x512x128xbf16, #tpu.memory_space<vmem>>, vector<1x512x128xbf16>,
    %cst_8 = arith.constant dense<0.000000e+00> : vector<128xf32>
    %9 = vector.multi_reduction <add>, %4, %cst_8 [0] : vector<512x128xf32> to vector<128xf32>
    %10 = vector.shape_cast %9 : vector<128xf32> to vector<1x128xf32>
    %cst_9 = arith.constant 0.001953125 : f32
    %11 = vector.broadcast %cst_9 : f32 to vector<1x128xf32>
    %12 = arith.mulf %10, %11 : vector<1x128xf32>
    %13 = vector.broadcast %12 : vector<1x128xf32> to vector<512x128xf32>
    %14 = arith.subf %4, %13 : vector<512x128xf32>
    %15 = arith.mulf %14, %14 : vector<512x128xf32>
    %cst_10 = arith.constant dense<0.000000e+00> : vector<128xf32>
    %16 = vector.multi_reduction <add>, %15, %cst_10 [0] : vector<512x128xf32> to vector<128xf32>
    %17 = vector.shape_cast %16 : vector<128xf32> to vector<1x128xf32>
    %18 = tpu.concatenate %10, %17 in 0 : vector<1x128xf32>, vector<1x128xf32> -> vector<2x128xf32>
    %c0_11 = arith.constant 0 : index
    %c0_12 = arith.constant 0 : index
    %c0_13 = arith.constant 0 : index
    %c0_14 = arith.constant 0 : index
    %19 = vector.load %arg5[%c0_11, %c0_12, %c0_13, %c0_14] : memref<1x1x2x128xf32, #tpu.memory_space<vmem>>, vector<1x1x2x128xf32>
    %20 = vector.shape_cast %19 : vector<1x1x2x128xf32> to vector<2x128xf32>
    %21 = vector.shape_cast %18 : vector<2x128xf32> to vector<1x1x2x128xf32>
    tpu.vector_store %arg5[%c0_11, %c0_12, %c0_13, %c0_14], %21 {strides = array<i32>} : memref<1x1x2x128xf32, #tpu.memory_space<vmem>>, vector<1x1x2x128xf32>,
    return
  }
  func.func @transform_0(%arg0: i32, %arg1: i32) -> (i32, i32, i32) {
    %c0_i32 = arith.constant 0 : i32
    %c0_i32_0 = arith.constant 0 : i32
    return %arg0, %arg1, %c0_i32 : i32, i32, i32
  }
  func.func @transform_1(%arg0: i32, %arg1: i32) -> (i32, i32, i32) {
    %c0_i32 = arith.constant 0 : i32
    %c0_i32_0 = arith.constant 0 : i32
    %c0_i32_1 = arith.constant 0 : i32
    return %arg0, %c0_i32, %c0_i32_0 : i32, i32, i32
  }
  func.func @transform_2(%arg0: i32, %arg1: i32) -> (i32, i32, i32) {
    %c0_i32 = arith.constant 0 : i32
    %c0_i32_0 = arith.constant 0 : i32
    return %arg0, %arg1, %c0_i32 : i32, i32, i32
  }
  func.func @transform_3(%arg0: i32, %arg1: i32) -> (i32, i32, i32, i32) {
    %c0_i32 = arith.constant 0 : i32
    %c0_i32_0 = arith.constant 0 : i32
    %c0_i32_1 = arith.constant 0 : i32
    return %arg0, %arg1, %c0_i32, %c0_i32_0 : i32, i32, i32, i32
  }
}

module attributes {stable_mosaic.version = 11 : i64} {
  func.func @_norm_relu_kernel(%arg0: i32, %arg1: i32, %arg2: memref<1x512x128xbf16, #tpu.memory_space<vmem>>, %arg3: memref<1x128xf32, #tpu.memory_space<vmem>>, %arg4: memref<1x128xf32, #tpu.memory_space<vmem>>, %arg5: memref<1x512x128xf32, #tpu.memory_space<vmem>>) attributes {dimension_semantics = [#tpu.dimension_semantics<parallel>, #tpu.dimension_semantics<parallel>], iteration_bounds = array<i64: 4, 1>, scalar_prefetch = 0 : i64, scratch_operands = 0 : i64, tpu.core_type = #tpu.core_type<tc>, window_params = [{transform_indices = @transform_0, window_bounds = array<i64: 1, 512, 128>}, {pipeline_mode = #tpu.pipeline_mode<synchronous>, transform_indices = @transform_1, window_bounds = array<i64: 1, 128>}, {pipeline_mode = #tpu.pipeline_mode<synchronous>, transform_indices = @transform_2, window_bounds = array<i64: 1, 128>}, {transform_indices = @transform_3, window_bounds = array<i64: 1, 512, 128>}]} {
    %c0 = arith.constant 0 : index
    %c0_0 = arith.constant 0 : index
    %c0_1 = arith.constant 0 : index
    %0 = vector.load %arg2[%c0, %c0_0, %c0_1] : memref<1x512x128xbf16, #tpu.memory_space<vmem>>, vector<1x512x128xbf16>
    %1 = vector.shape_cast %0 : vector<1x512x128xbf16> to vector<512x128xbf16>
    %2 = arith.extf %1 : vector<512x128xbf16> to vector<512x128xf32>
    %c0_2 = arith.constant 0 : index
    %c0_3 = arith.constant 0 : index
    %3 = vector.load %arg3[%c0_2, %c0_3] : memref<1x128xf32, #tpu.memory_space<vmem>>, vector<1x128xf32>
    %4 = vector.broadcast %3 : vector<1x128xf32> to vector<512x128xf32>
    %5 = arith.mulf %2, %4 : vector<512x128xf32>
    %c0_4 = arith.constant 0 : index
    %c0_5 = arith.constant 0 : index
    %6 = vector.load %arg4[%c0_4, %c0_5] : memref<1x128xf32, #tpu.memory_space<vmem>>, vector<1x128xf32>
    %7 = vector.broadcast %6 : vector<1x128xf32> to vector<512x128xf32>
    %8 = arith.addf %5, %7 : vector<512x128xf32>
    %cst = arith.constant 0.000000e+00 : f32
    %9 = vector.broadcast %cst : f32 to vector<512x128xf32>
    %10 = arith.maximumf %8, %9 : vector<512x128xf32>
    %c0_6 = arith.constant 0 : index
    %c0_7 = arith.constant 0 : index
    %c0_8 = arith.constant 0 : index
    %11 = vector.load %arg5[%c0_6, %c0_7, %c0_8] : memref<1x512x128xf32, #tpu.memory_space<vmem>>, vector<1x512x128xf32>
    %12 = vector.shape_cast %11 : vector<1x512x128xf32> to vector<512x128xf32>
    %13 = vector.shape_cast %10 : vector<512x128xf32> to vector<1x512x128xf32>
    tpu.vector_store %arg5[%c0_6, %c0_7, %c0_8], %13 {strides = array<i32>} : memref<1x512x128xf32, #tpu.memory_space<vmem>>, vector<1x512x128xf32>,
    return
  }
  func.func @transform_0(%arg0: i32, %arg1: i32) -> (i32, i32, i32) {
    %c0_i32 = arith.constant 0 : i32
    %c0_i32_0 = arith.constant 0 : i32
    return %arg0, %arg1, %c0_i32 : i32, i32, i32
  }
  func.func @transform_1(%arg0: i32, %arg1: i32) -> (i32, i32) {
    %c0_i32 = arith.constant 0 : i32
    %c0_i32_0 = arith.constant 0 : i32
    %c0_i32_1 = arith.constant 0 : i32
    return %c0_i32, %c0_i32_0 : i32, i32
  }
  func.func @transform_2(%arg0: i32, %arg1: i32) -> (i32, i32) {
    %c0_i32 = arith.constant 0 : i32
    %c0_i32_0 = arith.constant 0 : i32
    %c0_i32_1 = arith.constant 0 : i32
    return %c0_i32, %c0_i32_0 : i32, i32
  }
  func.func @transform_3(%arg0: i32, %arg1: i32) -> (i32, i32, i32) {
    %c0_i32 = arith.constant 0 : i32
    %c0_i32_0 = arith.constant 0 : i32
    return %arg0, %arg1, %c0_i32 : i32, i32, i32
  }
}

</mosaic_0001>

<bundles_post_ra>
// kernel: upconv_forward.2
= control target key start
LH: loop header
LB: loop body
LE: loop exit
PB: predicated region body
PF: predicated region fallthrough
CT: control target
= control target key end

     0   :  { %s2201_s12 = smov 0   ;;  %s2203_s13 = smov 0   ;;  %s2863_s0 = inlined_call_operand.vmem [shape: bf16[4,512,16], index: 0, kind: input, shape index: {}]   ;;  %s2864_s1 = inlined_call_operand.vmem [shape: bf16[4,16,128], index: 1, kind: input, shape index: {}]   ;;  %s2865_s2 = inlined_call_operand.vmem [shape: bf16[4,512,128], index: 2, kind: output, shape index: {0}]   ;;  %s2866_s3 = inlined_call_operand.vmem [shape: f32[4,1,2,128], index: 3, kind: output, shape index: {1}]  }
   0x1   :  { %s2205_s14 = smov 0  }
   0x2 LB: > { %s26_s15 = sadd.s32 1, %s2175_s13  ;;  %p1602_p0 = scmp.ge.s32.totalorder %s2179_s14, 1  ;;  %s2179_s14 = sphi %s2205_s14, %s14_s14   ;;  %s2175_s13 = sphi %s2203_s13, %s2910_s13   ;;  %s2171_s12 = sphi %s2201_s12, %s2909_s12  }
   0x3   : > { %p28_p1 = scmp.ge.s32.totalorder %s26_s15, 4  ;;  %p173_p2 = scmp.lt.s32.totalorder %s2179_s14, 5 }
   0x5   : > { %s2912_s15 = smov (%p28_p1, %s26_s15), 0  ;;  %p174_p3 = pnand %p1602_p0, %p173_p2 }
   0x7   : > { %177 = sbr.rel (%p174_p3) target bundleno = 531 (0x213), region = 28 }
   0xe   : > { %p218_p4 = scmp.lt.s32.totalorder %s2171_s12, 3  ;;  %vm482_vm0 = vcmask 130048   ;;  %vm1455_vm1 = vcmask 1040384  }
  0x10   : > { %s2914_s12 = smov (!%p218_p4, %s2171_s12), 3 }
  0x11   : > { %s1741_s16 = sshll.u32 %s2914_s12, 8  ;;  %s1742_s17 = sshll.u32 %s2914_s12, 3 }
  0x12   : > { %s2228_s20 = scalar_lea.vmem %s2863_s0, %s1741_s16  ;;  %s231_s23 = scalar_lea.vmem %s2864_s1, %s1742_s17 }
  0x13   : > { %v2124_v0 = vld [vmem:[%s231_s23] sm:$0xff]   ;;  %v2126_v2 = vld [vmem:[%s2228_s20 + $0x8] sm:$0xff]   ;;  %v2127_v3 = vld [vmem:[%s2228_s20 + $0x10] sm:$0xff]   ;;  %s2306_s26 = scalar_lea.vmem %s2865_s2, %s1741_s16  ;;  %s1609_s27 = sshll.u32 %s2914_s12, 1 }
  0x14   : > { %v2125_v1 = vld [vmem:[%s2228_s20] sm:$0xff]   ;;  %2032 = vmatprep.subr.bf16.mxu0 %v2124_v0  ;;  %2098 = vmatprep.subr.bf16.mxu1 %v2124_v0  ;;  %v2128_v4 = vld [vmem:[%s2228_s20 + $0x18] sm:$0xff]   ;;  %v2130_v6 = vld [vmem:[%s2228_s20 + $0x28] sm:$0xff]   ;;  %s248_s30 = scalar_lea.vmem %s2866_s3, %s1609_s27 }
  0x15   : > { %2033 = vmatpush3.bf16.msra.mxu0 %v2124_v0  ;;  %2034 = vmatprep.mubr.msk.bf16.mxu0 %vm482_vm0, %v2125_v1  ;;  %v2129_v5 = vld [vmem:[%s2228_s20 + $0x20] sm:$0xff]   ;;  %v2131_v7 = vld [vmem:[%s2228_s20 + $0x30] sm:$0xff]   ;;  %v2142_v9 = vld [vmem:[%s2228_s20 + $0x88] sm:$0xff]  }
  0x16   : > { %2099 = vmatpush3.bf16.msra.mxu1 %v2124_v0  ;;  %v2141_v8 = vld [vmem:[%s2228_s20 + $0x80] sm:$0xff]   ;;  %v2143_v10 = vld [vmem:[%s2228_s20 + $0x90] sm:$0xff]   ;;  %v2144_v11 = vld [vmem:[%s2228_s20 + $0x98] sm:$0xff]  }
  0x17   : > { %2066 = vmatprep.mubr.msk.bf16.mxu1 %vm482_vm0, %v2141_v8  ;;  %v2145_v12 = vld [vmem:[%s2228_s20 + $0xa0] sm:$0xff]   ;;  %v2132_v13 = vld [vmem:[%s2228_s20 + $0x38] sm:$0xff]   ;;  %v2146_v15 = vld [vmem:[%s2228_s20 + $0xa8] sm:$0xff]  }
  0x18   : > { %2035 = vmatmul.mubr.msk.bf16.vlgmr.msra.gmra.mrb[0].mxu0 %vm482_vm0, %v2126_v2  ;;  %v2133_v14 = vld [vmem:[%s2228_s20 + $0x40] sm:$0xff]   ;;  %v2147_v16 = vld [vmem:[%s2228_s20 + $0xb0] sm:$0xff]   ;;  %v2134_v17 = vld [vmem:[%s2228_s20 + $0x48] sm:$0xff]  }
  0x19   : > { %2038 = vmatprep.mubr.msk.bf16.mxu0 %vm482_vm0, %v2127_v3  ;;  %2067 = vmatmul.mubr.msk.bf16.vlgmr.msra.gmra.mrb[0].mxu1 %vm482_vm0, %v2142_v9  ;;  %v2135_v18 = vld [vmem:[%s2228_s20 + $0x50] sm:$0xff]   ;;  %v2148_v19 = vld [vmem:[%s2228_s20 + $0xb8] sm:$0xff]   ;;  %v2149_v20 = vld [vmem:[%s2228_s20 + $0xc0] sm:$0xff]  }
  0x1a   : > { %2070 = vmatprep.mubr.msk.bf16.mxu1 %vm482_vm0, %v2143_v10  ;;  %v2136_v21 = vld [vmem:[%s2228_s20 + $0x58] sm:$0xff]   ;;  %v2137_v22 = vld [vmem:[%s2228_s20 + $0x60] sm:$0xff]   ;;  %v2150_v23 = vld [vmem:[%s2228_s20 + $0xc8] sm:$0xff]  }
  0x1b   : > { %v2151_v24 = vld [vmem:[%s2228_s20 + $0xd0] sm:$0xff]   ;;  %v2138_v25 = vld [vmem:[%s2228_s20 + $0x68] sm:$0xff]   ;;  %v2152_v27 = vld [vmem:[%s2228_s20 + $0xd8] sm:$0xff]  }
  0x1c   : > { %v2139_v26 = vld [vmem:[%s2228_s20 + $0x70] sm:$0xff]   ;;  %v2153_v28 = vld [vmem:[%s2228_s20 + $0xe0] sm:$0xff]   ;;  %v2140_v29 = vld [vmem:[%s2228_s20 + $0x78] sm:$0xff]  }
  0x1d   : > { %v2154_v30 = vld [vmem:[%s2228_s20 + $0xe8] sm:$0xff]   ;;  %v2155_v31 = vld [vmem:[%s2228_s20 + $0xf0] sm:$0xff]   ;;  %v2156_v32 = vld [vmem:[%s2228_s20 + $0xf8] sm:$0xff]  }
  0x20   : > { %2039 = vmatmul.mubr.msk.bf16.gmra.mrb[4].mxu0 %vm482_vm0, %v2128_v4 }
  0x21   : > { %2042 = vmatprep.mubr.msk.bf16.mxu0 %vm482_vm0, %v2129_v5  ;;  %2071 = vmatmul.mubr.msk.bf16.gmra.mrb[4].mxu1 %vm482_vm0, %v2144_v11 }
  0x22   : > { %2074 = vmatprep.mubr.msk.bf16.mxu1 %vm482_vm0, %v2145_v12 }
  0x28   : > { %2043 = vmatmul.mubr.msk.bf16.gmra.mrb[8].mxu0 %vm482_vm0, %v2130_v6 }
  0x29   : > { %2046 = vmatprep.mubr.msk.bf16.mxu0 %vm482_vm0, %v2131_v7  ;;  %2075 = vmatmul.mubr.msk.bf16.gmra.mrb[8].mxu1 %vm482_vm0, %v2146_v15 }
  0x2a   : > { %2078 = vmatprep.mubr.msk.bf16.mxu1 %vm482_vm0, %v2147_v16 }
  0x30   : > { %2047 = vmatmul.mubr.msk.bf16.gmra.mrb[12].mxu0 %vm482_vm0, %v2132_v13 }
  0x31   : > { %2050 = vmatprep.mubr.msk.bf16.mxu0 %vm482_vm0, %v2133_v14  ;;  %2079 = vmatmul.mubr.msk.bf16.gmra.mrb[12].mxu1 %vm482_vm0, %v2148_v19 }
  0x32   : > { %2082 = vmatprep.mubr.msk.bf16.mxu1 %vm482_vm0, %v2149_v20 }
  0x38   : > { %2051 = vmatmul.mubr.msk.bf16.gmra.mrb[16].mxu0 %vm482_vm0, %v2134_v17 }
  0x39   : > { %2054 = vmatprep.mubr.msk.bf16.mxu0 %vm482_vm0, %v2135_v18  ;;  %2083 = vmatmul.mubr.msk.bf16.gmra.mrb[16].mxu1 %vm482_vm0, %v2150_v23 }
  0x3a   : > { %2086 = vmatprep.mubr.msk.bf16.mxu1 %vm482_vm0, %v2151_v24 }
  0x40   : > { %2055 = vmatmul.mubr.msk.bf16.gmra.mrb[20].mxu0 %vm482_vm0, %v2136_v21 }
  0x41   : > { %2058 = vmatprep.mubr.msk.bf16.mxu0 %vm482_vm0, %v2137_v22  ;;  %2087 = vmatmul.mubr.msk.bf16.gmra.mrb[20].mxu1 %vm482_vm0, %v2152_v27 }
  0x42   : > { %2090 = vmatprep.mubr.msk.bf16.mxu1 %vm482_vm0, %v2153_v28 }
  0x48   : > { %2059 = vmatmul.mubr.msk.bf16.gmra.mrb[24].mxu0 %vm482_vm0, %v2138_v25 }
  0x49   : > { %2062 = vmatprep.mubr.msk.bf16.mxu0 %vm482_vm0, %v2139_v26  ;;  %2091 = vmatmul.mubr.msk.bf16.gmra.mrb[24].mxu1 %vm482_vm0, %v2154_v30 }
  0x4a   : > { %2094 = vmatprep.mubr.msk.bf16.mxu1 %vm482_vm0, %v2155_v31 }
  0x50   : > { %2063 = vmatmul.mubr.msk.bf16.gmra.mrb[28].mxu0 %vm482_vm0, %v2140_v29 }
  0x51   : > { %2095 = vmatmul.mubr.msk.bf16.gmra.mrb[28].mxu1 %vm482_vm0, %v2156_v32 }
  0xeb   : > { %v2297_v33 = vpop.f32.mrb[0].mxu0 }
  0xec   : > { %v2299_v34 = vpop.f32.mrb[1].mxu0  ;;  %v2339_v51 = vpop.f32.mrb[0].mxu1 }
  0xed   : > { %v2308_v35 = vpop.f32.mrb[2].mxu0  ;;  %v2341_v52 = vpop.f32.mrb[1].mxu1 }
  0xee   : > { %v1816_v36 = vpack.c.bf16 %v2308_v35, %v2297_v33  ;;  %v2312_v37 = vpop.f32.mrb[3].mxu0  ;;  %2881 = vst [vmem:[#allocation2_spill] sm:$0xff] %v2341_v52  ;;  %v2346_v55 = vpop.f32.mrb[2].mxu1 }
  0xef   : > { %v1811_v38 = vpack.c.bf16 %v2312_v37, %v2299_v34  ;;  %v1188_v39 = vadd.f32 %v2312_v37, %v2299_v34  ;;  %v1896_v57 = vpack.c.bf16 %v2346_v55, %v2339_v51  ;;  %v2352_v58 = vpop.f32.mrb[3].mxu1 }
  0xf0   : > { %1968 = vst [vmem:[%s2306_s26 + $0x8] sm:$0xff] %v1816_v36   ;;  %v1891_v61 = vpack.c.bf16 %v2352_v58, %v2341_v52 }
  0xf1   : > { %1812 = vst [vmem:[%s2306_s26] sm:$0xff] %v1811_v38   ;;  %v1189_v40 = vadd.f32 %v2297_v33, %v1188_v39  ;;  %1984 = vst [vmem:[%s2306_s26 + $0x88] sm:$0xff] %v1896_v57  }
  0xf2   : > { %1983 = vst [vmem:[%s2306_s26 + $0x80] sm:$0xff] %v1891_v61  }
  0xf3   : > { %v2321_v41 = vpop.f32.mrb[4].mxu0  ;;  %v1190_v42 = vadd.f32 %v2308_v35, %v1189_v40 }
  0xf4   : > { %v2324_v43 = vpop.f32.mrb[5].mxu0  ;;  %v2371_v3 = vpop.f32.mrb[4].mxu1 }
  0xf5   : > { %v1191_v44 = vadd.f32 %v1190_v42, %v2324_v43  ;;  %v2327_v45 = vpop.f32.mrb[6].mxu0  ;;  %v2373_v4 = vpop.f32.mrb[5].mxu1 }
  0xf6   : > { %v1826_v46 = vpack.c.bf16 %v2327_v45, %v2321_v41  ;;  %v2331_v47 = vpop.f32.mrb[7].mxu0  ;;  %v2378_v7 = vpop.f32.mrb[6].mxu1 }
  0xf7   : > { %v1821_v48 = vpack.c.bf16 %v2331_v47, %v2324_v43  ;;  %v1192_v49 = vadd.f32 %v1191_v44, %v2331_v47  ;;  %v1906_v9 = vpack.c.bf16 %v2378_v7, %v2371_v3  ;;  %v2384_v10 = vpop.f32.mrb[7].mxu1 }
  0xf8   : > { %1970 = vst [vmem:[%s2306_s26 + $0x18] sm:$0xff] %v1826_v46   ;;  %v1901_v13 = vpack.c.bf16 %v2384_v10, %v2373_v4 }
  0xf9   : > { %1969 = vst [vmem:[%s2306_s26 + $0x10] sm:$0xff] %v1821_v48   ;;  %v1193_v50 = vadd.f32 %v2321_v41, %v1192_v49  ;;  %1986 = vst [vmem:[%s2306_s26 + $0x98] sm:$0xff] %v1906_v9  }
  0xfa   : > { %1985 = vst [vmem:[%s2306_s26 + $0x90] sm:$0xff] %v1901_v13  }
  0xfb   : > { %v2343_v53 = vpop.f32.mrb[8].mxu0  ;;  %v1194_v54 = vadd.f32 %v2327_v45, %v1193_v50 }
  0xfc   : > { %v2348_v56 = vpop.f32.mrb[9].mxu0  ;;  %v2403_v19 = vpop.f32.mrb[8].mxu1 }
  0xfd   : > { %v1195_v59 = vadd.f32 %v1194_v54, %v2348_v56  ;;  %v2355_v60 = vpop.f32.mrb[10].mxu0  ;;  %v2405_v20 = vpop.f32.mrb[9].mxu1 }
  0xfe   : > { %v1836_v62 = vpack.c.bf16 %v2355_v60, %v2343_v53  ;;  %v2361_v63 = vpop.f32.mrb[11].mxu0  ;;  %v2410_v23 = vpop.f32.mrb[10].mxu1 }
  0xff   : > { %v1831_v0 = vpack.c.bf16 %v2361_v63, %v2348_v56  ;;  %v1196_v1 = vadd.f32 %v1195_v59, %v2361_v63  ;;  %v1916_v25 = vpack.c.bf16 %v2410_v23, %v2403_v19  ;;  %v2416_v26 = vpop.f32.mrb[11].mxu1 }
 0x100   : > { %1972 = vst [vmem:[%s2306_s26 + $0x28] sm:$0xff] %v1836_v62   ;;  %v1911_v29 = vpack.c.bf16 %v2416_v26, %v2405_v20 }
 0x101   : > { %1971 = vst [vmem:[%s2306_s26 + $0x20] sm:$0xff] %v1831_v0   ;;  %v1197_v2 = vadd.f32 %v2343_v53, %v1196_v1  ;;  %1988 = vst [vmem:[%s2306_s26 + $0xa8] sm:$0xff] %v1916_v25  }
 0x102   : > { %1987 = vst [vmem:[%s2306_s26 + $0xa0] sm:$0xff] %v1911_v29  }
 0x103   : > { %v2375_v5 = vpop.f32.mrb[12].mxu0  ;;  %v1198_v6 = vadd.f32 %v2355_v60, %v1197_v2 }
 0x104   : > { %v2380_v8 = vpop.f32.mrb[13].mxu0  ;;  %v2435_v39 = vpop.f32.mrb[12].mxu1 }
 0x105   : > { %v1199_v11 = vadd.f32 %v1198_v6, %v2380_v8  ;;  %v2387_v12 = vpop.f32.mrb[14].mxu0  ;;  %v2437_v40 = vpop.f32.mrb[13].mxu1 }
 0x106   : > { %v1846_v14 = vpack.c.bf16 %v2387_v12, %v2375_v5  ;;  %v2393_v15 = vpop.f32.mrb[15].mxu0  ;;  %v2442_v46 = vpop.f32.mrb[14].mxu1 }
 0x107   : > { %v1841_v16 = vpack.c.bf16 %v2393_v15, %v2380_v8  ;;  %v1200_v17 = vadd.f32 %v1199_v11, %v2393_v15  ;;  %v1926_v49 = vpack.c.bf16 %v2442_v46, %v2435_v39  ;;  %v2448_v50 = vpop.f32.mrb[15].mxu1 }
 0x108   : > { %1974 = vst [vmem:[%s2306_s26 + $0x38] sm:$0xff] %v1846_v14   ;;  %v1921_v59 = vpack.c.bf16 %v2448_v50, %v2437_v40 }
 0x109   : > { %1973 = vst [vmem:[%s2306_s26 + $0x30] sm:$0xff] %v1841_v16   ;;  %v1201_v18 = vadd.f32 %v2375_v5, %v1200_v17  ;;  %1990 = vst [vmem:[%s2306_s26 + $0xb8] sm:$0xff] %v1926_v49  }
 0x10a   : > { %1989 = vst [vmem:[%s2306_s26 + $0xb0] sm:$0xff] %v1921_v59  }
 0x10b   : > { %v2407_v21 = vpop.f32.mrb[16].mxu0  ;;  %v1202_v22 = vadd.f32 %v2387_v12, %v1201_v18 }
 0x10c   : > { %v2412_v24 = vpop.f32.mrb[17].mxu0  ;;  %v2467_v6 = vpop.f32.mrb[16].mxu1 }
 0x10d   : > { %v1203_v27 = vadd.f32 %v1202_v22, %v2412_v24  ;;  %v2419_v28 = vpop.f32.mrb[18].mxu0  ;;  %v2469_v9 = vpop.f32.mrb[17].mxu1 }
 0x10e   : > { %2882 = vst [vmem:[#allocation3_spill] sm:$0xff] %v2419_v28  ;;  %v1856_v30 = vpack.c.bf16 %v2419_v28, %v2407_v21  ;;  %v2425_v31 = vpop.f32.mrb[19].mxu0  ;;  %v2474_v14 = vpop.f32.mrb[18].mxu1 }
 0x10f   : > { %v1851_v32 = vpack.c.bf16 %v2425_v31, %v2412_v24  ;;  %v1204_v36 = vadd.f32 %v1203_v27, %v2425_v31  ;;  %v1936_v17 = vpack.c.bf16 %v2474_v14, %v2467_v6  ;;  %v2480_v18 = vpop.f32.mrb[19].mxu1 }
 0x110   : > { %1976 = vst [vmem:[%s2306_s26 + $0x48] sm:$0xff] %v1856_v30   ;;  %v1931_v27 = vpack.c.bf16 %v2480_v18, %v2469_v9 }
 0x111   : > { %1975 = vst [vmem:[%s2306_s26 + $0x40] sm:$0xff] %v1851_v32   ;;  %v1205_v38 = vadd.f32 %v2407_v21, %v1204_v36  ;;  %1992 = vst [vmem:[%s2306_s26 + $0xc8] sm:$0xff] %v1936_v17  }
 0x112   : > { %1991 = vst [vmem:[%s2306_s26 + $0xc0] sm:$0xff] %v1931_v27  }
 0x113   : > { %v2439_v42 = vpop.f32.mrb[20].mxu0  ;;  %v1206_v44 = vadd.f32 %v2419_v28, %v1205_v38 }
 0x114   : > { %2883 = vst [vmem:[#allocation4_spill] sm:$0xff] %v2439_v42  ;;  %v2444_v48 = vpop.f32.mrb[21].mxu0 }
 0x115   : > { %2884 = vst [vmem:[#allocation5_spill] sm:$0xff] %v2444_v48  ;;  %v1207_v54 = vadd.f32 %v1206_v44, %v2444_v48  ;;  %v2451_v57 = vpop.f32.mrb[22].mxu0  ;;  %v2499_v44 = vpop.f32.mrb[20].mxu1 }
 0x116   : > { %2885 = vst [vmem:[#allocation6_spill] sm:$0xff] %v2451_v57  ;;  %v1866_v61 = vpack.c.bf16 %v2451_v57, %v2439_v42  ;;  %v2457_v62 = vpop.f32.mrb[23].mxu0  ;;  %v2501_v49 = vpop.f32.mrb[21].mxu1 }
 0x117   : > { %2886 = vst [vmem:[#allocation7_spill] sm:$0xff] %v2457_v62  ;;  %v1861_v0 = vpack.c.bf16 %v2457_v62, %v2444_v48  ;;  %v1208_v1 = vadd.f32 %v1207_v54, %v2457_v62 }
 0x118   : > { %1978 = vst [vmem:[%s2306_s26 + $0x58] sm:$0xff] %v1866_v61   ;;  %v2506_v61 = vpop.f32.mrb[22].mxu1 }
 0x119   : > { %1977 = vst [vmem:[%s2306_s26 + $0x50] sm:$0xff] %v1861_v0   ;;  %v1209_v2 = vadd.f32 %v2439_v42, %v1208_v1  ;;  %v1946_v1 = vpack.c.bf16 %v2506_v61, %v2499_v44 }
 0x11b   : > { %v2471_v11 = vpop.f32.mrb[24].mxu0  ;;  %v1210_v13 = vadd.f32 %v2451_v57, %v1209_v2  ;;  %v2512_v2 = vpop.f32.mrb[23].mxu1  ;;  %1994 = vst [vmem:[%s2306_s26 + $0xd8] sm:$0xff] %v1946_v1  }
 0x11c   : > { %2887 = vst [vmem:[#allocation8_spill] sm:$0xff] %v2471_v11  ;;  %v2476_v16 = vpop.f32.mrb[25].mxu0 }
 0x11d   : > { %2888 = vst [vmem:[#allocation9_spill] sm:$0xff] %v2476_v16  ;;  %v1211_v22 = vadd.f32 %v1210_v13, %v2476_v16  ;;  %v2483_v25 = vpop.f32.mrb[26].mxu0 }
 0x11e   : > { %2889 = vst [vmem:[#allocation10_spill] sm:$0xff] %v2483_v25  ;;  %v1876_v29 = vpack.c.bf16 %v2483_v25, %v2471_v11  ;;  %v2489_v30 = vpop.f32.mrb[27].mxu0 }
 0x11f   : > { %2890 = vst [vmem:[#allocation11_spill] sm:$0xff] %v2489_v30  ;;  %v1871_v32 = vpack.c.bf16 %v2489_v30, %v2476_v16  ;;  %v1212_v36 = vadd.f32 %v1211_v22, %v2489_v30  ;;  %v1941_v22 = vpack.c.bf16 %v2512_v2, %v2501_v49 }
 0x120   : > { %1980 = vst [vmem:[%s2306_s26 + $0x68] sm:$0xff] %v1876_v29  }
 0x121   : > { %1979 = vst [vmem:[%s2306_s26 + $0x60] sm:$0xff] %v1871_v32   ;;  %v1213_v38 = vadd.f32 %v2471_v11, %v1212_v36  ;;  %1993 = vst [vmem:[%s2306_s26 + $0xd0] sm:$0xff] %v1941_v22  }
 0x123   : > { %v2503_v54 = vpop.f32.mrb[28].mxu0  ;;  %v1214_v59 = vadd.f32 %v2483_v25, %v1213_v38 }
 0x124   : > { %2891 = vst [vmem:[#allocation12_spill] sm:$0xff] %v2503_v54  ;;  %v2508_v0 = vpop.f32.mrb[29].mxu0 }
 0x125   : > { %2892 = vst [vmem:[#allocation13_spill] sm:$0xff] %v2508_v0  ;;  %v1215_v13 = vadd.f32 %v1214_v59, %v2508_v0  ;;  %v2515_v17 = vpop.f32.mrb[30].mxu0  ;;  %v2531_v59 = vpop.f32.mrb[24].mxu1 }
 0x126   : > { %2893 = vst [vmem:[#allocation14_spill] sm:$0xff] %v2515_v17  ;;  %v1886_v27 = vpack.c.bf16 %v2515_v17, %v2503_v54  ;;  %v2521_v29 = vpop.f32.mrb[31].mxu0  ;;  %v2533_v25 = vpop.f32.mrb[25].mxu1 }
 0x127   : > { %2894 = vst [vmem:[#allocation15_spill] sm:$0xff] %v2521_v29  ;;  %v1881_v32 = vpack.c.bf16 %v2521_v29, %v2508_v0  ;;  %v1216_v36 = vadd.f32 %v1215_v13, %v2521_v29  ;;  %v2536_v30 = vpop.f32.mrb[26].mxu1 }
 0x128   : > { %1982 = vst [vmem:[%s2306_s26 + $0x78] sm:$0xff] %v1886_v27   ;;  %v1956_v1 = vpack.c.bf16 %v2536_v30, %v2531_v59  ;;  %v2540_v0 = vpop.f32.mrb[27].mxu1 }
 0x129   : > { %1981 = vst [vmem:[%s2306_s26 + $0x70] sm:$0xff] %v1881_v32   ;;  %v1217_v38 = vadd.f32 %v2503_v54, %v1216_v36  ;;  %v1951_v22 = vpack.c.bf16 %v2540_v0, %v2533_v25  ;;  %v2549_v36 = vpop.f32.mrb[28].mxu1 }
 0x12a   : > { %1996 = vst [vmem:[%s2306_s26 + $0xe8] sm:$0xff] %v1956_v1  }
 0x12b   : > { %v1218_v11 = vadd.f32 %v2515_v17, %v1217_v38  ;;  %1995 = vst [vmem:[%s2306_s26 + $0xe0] sm:$0xff] %v1951_v22   ;;  %v2551_v38 = vpop.f32.mrb[29].mxu1 }
 0x12c   : > { %v2554_v54 = vpop.f32.mrb[30].mxu1 }
 0x12d   : > { %v1219_v13 = vadd.f32 %v1218_v11, %v2341_v52  ;;  %v1966_v11 = vpack.c.bf16 %v2554_v54, %v2549_v36  ;;  %v2558_v52 = vpop.f32.mrb[31].mxu1 }
 0x12f   : > { %v1220_v27 = vadd.f32 %v1219_v13, %v2352_v58  ;;  %v1961_v13 = vpack.c.bf16 %v2558_v52, %v2551_v38  ;;  %1998 = vst [vmem:[%s2306_s26 + $0xf8] sm:$0xff] %v1966_v11  }
 0x131   : > { %v1221_v32 = vadd.f32 %v2339_v51, %v1220_v27  ;;  %1997 = vst [vmem:[%s2306_s26 + $0xf0] sm:$0xff] %v1961_v13  }
 0x133   : > { %v1222_v17 = vadd.f32 %v2346_v55, %v1221_v32 }
 0x135   : > { %v1223_v1 = vadd.f32 %v1222_v17, %v2373_v4 }
 0x137   : > { %v1224_v22 = vadd.f32 %v1223_v1, %v2384_v10 }
 0x139   : > { %v1225_v27 = vadd.f32 %v2371_v3, %v1224_v22 }
 0x13b   : > { %v1226_v32 = vadd.f32 %v2378_v7, %v1225_v27 }
 0x13d   : > { %v1227_v29 = vadd.f32 %v1226_v32, %v2405_v20 }
 0x13f   : > { %v1228_v16 = vadd.f32 %v1227_v29, %v2416_v26 }
 0x141   : > { %v1229_v57 = vadd.f32 %v2403_v19, %v1228_v16 }
 0x143   : > { %v1230_v42 = vadd.f32 %v2410_v23, %v1229_v57 }
 0x145   : > { %v1231_v17 = vadd.f32 %v1230_v42, %v2437_v40 }
 0x147   : > { %v1232_v62 = vadd.f32 %v1231_v17, %v2448_v50 }
 0x149   : > { %v1233_v11 = vadd.f32 %v2435_v39, %v1232_v62 }
 0x14b   : > { %v1234_v1 = vadd.f32 %v2442_v46, %v1233_v11 }
 0x14d   : > { %v1235_v13 = vadd.f32 %v1234_v1, %v2469_v9 }
 0x14f   : > { %v1236_v22 = vadd.f32 %v1235_v13, %v2480_v18 }
 0x151   : > { %v1237_v27 = vadd.f32 %v2467_v6, %v1236_v22 }
 0x153   : > { %v1238_v29 = vadd.f32 %v2474_v14, %v1237_v27 }
 0x155   : > { %v1239_v16 = vadd.f32 %v1238_v29, %v2501_v49 }
 0x157   : > { %v1240_v57 = vadd.f32 %v1239_v16, %v2512_v2 }
 0x159   : > { %v1241_v42 = vadd.f32 %v2499_v44, %v1240_v57 }
 0x15b   : > { %v1242_v32 = vadd.f32 %v2506_v61, %v1241_v42 }
 0x15d   : > { %v1243_v62 = vadd.f32 %v1242_v32, %v2533_v25 }
 0x15f   : > { %v1244_v17 = vadd.f32 %v1243_v62, %v2540_v0 }
 0x161   : > { %v1245_v11 = vadd.f32 %v2531_v59, %v1244_v17 }
 0x163   : > { %v1246_v1 = vadd.f32 %v2536_v30, %v1245_v11 }
 0x165   : > { %v1247_v13 = vadd.f32 %v1246_v1, %v2551_v38 }
 0x167   : > { %v1248_v22 = vadd.f32 %v1247_v13, %v2558_v52 }
 0x169   : > { %v1249_v27 = vadd.f32 %v2549_v36, %v1248_v22 }
 0x16b   : > { %v1250_v29 = vadd.f32 %v2554_v54, %v1249_v27 }
 0x16d   : > { %v1251_v16 = vrot.slane %v1250_v29, 4 }
 0x16f   : > { %v1252_v57 = vadd.f32 %v1251_v16, %v1250_v29 }
 0x171   : > { %v1253_v48 = vrot.slane %v1252_v57, 2 }
 0x173   : > { %v1254_v42 = vadd.f32 %v1253_v48, %v1252_v57 }
 0x175   : > { %v1255_v28 = vrot.slane %v1254_v42, 1 }
 0x177   : > { %v2592_v32 = vadd.f32 %v1255_v28, %v1254_v42 }
 0x179   : > { %v2595_v62 = vmul.f32 0.001953125, %v2592_v32 }
 0x17b   : > { %v2599_v17 = vsub.f32 %v2352_v58, %v2595_v62  ;;  %v2603_v11 = vsub.f32 %v2339_v51, %v2595_v62  ;;  %v2607_v1 = vsub.f32 %v2346_v55, %v2595_v62  ;;  %v2611_v48 = vsub.f32 %v2373_v4, %v2595_v62 }
 0x17c   : > { %v2615_v28 = vsub.f32 %v2384_v10, %v2595_v62  ;;  %v2619_v58 = vsub.f32 %v2371_v3, %v2595_v62  ;;  %v2623_v51 = vsub.f32 %v2378_v7, %v2595_v62  ;;  %v2627_v55 = vsub.f32 %v2405_v20, %v2595_v62 }
 0x17d   : > { %v2631_v4 = vsub.f32 %v2416_v26, %v2595_v62  ;;  %v2635_v10 = vsub.f32 %v2403_v19, %v2595_v62  ;;  %v2639_v3 = vsub.f32 %v2410_v23, %v2595_v62  ;;  %v2643_v7 = vsub.f32 %v2437_v40, %v2595_v62 }
 0x17e   : > { %v2647_v20 = vsub.f32 %v2448_v50, %v2595_v62  ;;  %v2651_v26 = vsub.f32 %v2435_v39, %v2595_v62  ;;  %v2655_v19 = vsub.f32 %v2442_v46, %v2595_v62  ;;  %v2659_v23 = vsub.f32 %v2469_v9, %v2595_v62 }
 0x17f   : > { %v2663_v40 = vsub.f32 %v2480_v18, %v2595_v62  ;;  %v2667_v50 = vsub.f32 %v2467_v6, %v2595_v62  ;;  %v2671_v39 = vsub.f32 %v2474_v14, %v2595_v62  ;;  %v2675_v46 = vsub.f32 %v2501_v49, %v2595_v62 }
 0x180   : > { %v2679_v9 = vsub.f32 %v2512_v2, %v2595_v62  ;;  %v2683_v18 = vsub.f32 %v2499_v44, %v2595_v62  ;;  %v2687_v6 = vsub.f32 %v2506_v61, %v2595_v62  ;;  %v2691_v14 = vsub.f32 %v2533_v25, %v2595_v62 }
 0x181   : > { %v2695_v49 = vsub.f32 %v2540_v0, %v2595_v62  ;;  %v2699_v2 = vsub.f32 %v2531_v59, %v2595_v62  ;;  %v2703_v44 = vsub.f32 %v2536_v30, %v2595_v62  ;;  %v2707_v61 = vsub.f32 %v2551_v38, %v2595_v62 }
 0x182   : > { %v2711_v25 = vsub.f32 %v2558_v52, %v2595_v62  ;;  %v2715_v0 = vsub.f32 %v2549_v36, %v2595_v62  ;;  %v2719_v59 = vsub.f32 %v2554_v54, %v2595_v62  ;;  %v1258_v30 = vsub.f32 %v2299_v34, %v2595_v62 }
 0x183   : > { %v1259_v13 = vsub.f32 %v2312_v37, %v2595_v62  ;;  %v1260_v38 = vsub.f32 %v2297_v33, %v2595_v62  ;;  %v1261_v27 = vsub.f32 %v2308_v35, %v2595_v62  ;;  %v1262_v36 = vsub.f32 %v2324_v43, %v2595_v62 }
 0x184   : > { %v1322_v22 = vmul.f32 %v1258_v30, %v1258_v30  ;;  %v1263_v16 = vsub.f32 %v2331_v47, %v2595_v62  ;;  %v1264_v37 = vsub.f32 %v2321_v41, %v2595_v62  ;;  %v1265_v30 = vsub.f32 %v2327_v45, %v2595_v62 }
 0x185   : > { %v1323_v52 = vmul.f32 %v1259_v13, %v1259_v13  ;;  %v1324_v29 = vmul.f32 %v1260_v38, %v1260_v38  ;;  %v1325_v34 = vmul.f32 %v1261_v27, %v1261_v27  ;;  %v1326_v42 = vmul.f32 %v1262_v36, %v1262_v36 }
 0x186   : > { %v1327_v13 = vmul.f32 %v1263_v16, %v1263_v16  ;;  %v1266_v43 = vsub.f32 %v2348_v56, %v2595_v62  ;;  %v1328_v38 = vmul.f32 %v1264_v37, %v1264_v37  ;;  %v1267_v47 = vsub.f32 %v2361_v63, %v2595_v62 }
 0x187   : > { %v1386_v54 = vadd.f32 %v1323_v52, %v1322_v22  ;;  %v1329_v52 = vmul.f32 %v1265_v30, %v1265_v30  ;;  %v1268_v41 = vsub.f32 %v2343_v53, %v2595_v62  ;;  %v1269_v45 = vsub.f32 %v2355_v60, %v2595_v62 }
 0x188   : > { %v1330_v36 = vmul.f32 %v1266_v43, %v1266_v43  ;;  %v1270_v56 = vsub.f32 %v2380_v8, %v2595_v62  ;;  %v1271_v63 = vsub.f32 %v2393_v15, %v2595_v62  ;;  %v1272_v53 = vsub.f32 %v2375_v5, %v2595_v62 }
 0x189   : > { %v1387_v57 = vadd.f32 %v1386_v54, %v1324_v29  ;;  %v1331_v54 = vmul.f32 %v1267_v47, %v1267_v47  ;;  %v1333_v37 = vmul.f32 %v1269_v45, %v1269_v45  ;;  %v1273_v60 = vsub.f32 %v2387_v12, %v2595_v62  ;;  %v2896_v45 = vld [vmem:[#allocation5_spill] sm:$0xff] }
 0x18a   : > { %v1274_v8 = vsub.f32 %v2412_v24, %v2595_v62  ;;  %v1336_v43 = vmul.f32 %v1272_v53, %v1272_v53  ;;  %v1275_v15 = vsub.f32 %v2425_v31, %v2595_v62  ;;  %v1276_v5 = vsub.f32 %v2407_v21, %v2595_v62  ;;  %v2899_v53 = vld [vmem:[#allocation6_spill] sm:$0xff] }
 0x18b   : > { %v1388_v33 = vadd.f32 %v1387_v57, %v1325_v34  ;;  %v1332_v34 = vmul.f32 %v1268_v41, %v1268_v41  ;;  %v2895_v41 = vld [vmem:[#allocation3_spill] sm:$0xff]  ;;  %v1278_v24 = vsub.f32 %v2896_v45, %v2595_v62 }
 0x18c   : > { %v1277_v12 = vsub.f32 %v2895_v41, %v2595_v62 }
 0x18d   : > { %v1389_v35 = vadd.f32 %v1388_v33, %v1326_v42  ;;  %v1334_v33 = vmul.f32 %v1270_v56, %v1270_v56  ;;  %v2897_v56 = vld [vmem:[#allocation7_spill] sm:$0xff] }
 0x18e   : > { %v1279_v31 = vsub.f32 %v2897_v56, %v2595_v62 }
 0x18f   : > { %v1390_v22 = vadd.f32 %v1389_v35, %v1327_v13  ;;  %v1335_v13 = vmul.f32 %v1271_v63, %v1271_v63  ;;  %v2898_v63 = vld [vmem:[#allocation4_spill] sm:$0xff] }
 0x190   : > { %v1280_v21 = vsub.f32 %v2898_v63, %v2595_v62 }
 0x191   : > { %v1391_v27 = vadd.f32 %v1390_v22, %v1328_v38  ;;  %v1337_v22 = vmul.f32 %v1273_v60, %v1273_v60 }
 0x193   : > { %v1392_v29 = vadd.f32 %v1391_v27, %v1329_v52  ;;  %v1338_v52 = vmul.f32 %v1274_v8, %v1274_v8  ;;  %v1344_v8 = vmul.f32 %v1280_v21, %v1280_v21  ;;  %v2906_v21 = vld [vmem:[#allocation12_spill] sm:$0xff] }
 0x195   : > { %v1393_v16 = vadd.f32 %v1392_v29, %v1330_v36  ;;  %v1339_v36 = vmul.f32 %v1275_v15, %v1275_v15 }
 0x197   : > { %v1394_v57 = vadd.f32 %v1393_v16, %v1331_v54  ;;  %v1340_v54 = vmul.f32 %v1276_v5, %v1276_v5  ;;  %v2902_v5 = vld [vmem:[#allocation8_spill] sm:$0xff] }
 0x199   : > { %v1395_v42 = vadd.f32 %v1394_v57, %v1332_v34  ;;  %v1341_v34 = vmul.f32 %v1277_v12, %v1277_v12  ;;  %v2903_v12 = vld [vmem:[#allocation10_spill] sm:$0xff] }
 0x19b   : > { %v1396_v30 = vadd.f32 %v1395_v42, %v1333_v37  ;;  %v1342_v37 = vmul.f32 %v1278_v24, %v1278_v24  ;;  %v2904_v24 = vld [vmem:[#allocation13_spill] sm:$0xff] }
 0x19d   : > { %v1397_v35 = vadd.f32 %v1396_v30, %v1334_v33  ;;  %v1281_v33 = vsub.f32 %v2899_v53, %v2595_v62  ;;  %v1343_v30 = vmul.f32 %v1279_v31, %v1279_v31  ;;  %v2905_v31 = vld [vmem:[#allocation15_spill] sm:$0xff] }
 0x19f   : > { %v1398_v38 = vadd.f32 %v1397_v35, %v1335_v13  ;;  %v2900_v13 = vld [vmem:[#allocation9_spill] sm:$0xff] }
 0x1a0   : > { %v1282_v35 = vsub.f32 %v2900_v13, %v2595_v62 }
 0x1a1   : > { %v1399_v47 = vadd.f32 %v1398_v38, %v1336_v43  ;;  %v2901_v38 = vld [vmem:[#allocation11_spill] sm:$0xff] }
 0x1a2   : > { %v1283_v15 = vsub.f32 %v2901_v38, %v2595_v62 }
 0x1a3   : > { %v1400_v27 = vadd.f32 %v1399_v47, %v1337_v22  ;;  %v1345_v22 = vmul.f32 %v1281_v33, %v1281_v33  ;;  %v2907_v33 = vld [vmem:[#allocation14_spill] sm:$0xff] }
 0x1a5   : > { %v1401_v29 = vadd.f32 %v1400_v27, %v1338_v52  ;;  %v1284_v52 = vsub.f32 %v2902_v5, %v2595_v62  ;;  %v1346_v27 = vmul.f32 %v1282_v35, %v1282_v35  ;;  %v2908_v35 = vld [vmem:[#allocation2_spill] sm:$0xff] }
 0x1a7   : > { %v1402_v16 = vadd.f32 %v1401_v29, %v1339_v36  ;;  %v1285_v36 = vsub.f32 %v2903_v12, %v2595_v62  ;;  %v1347_v29 = vmul.f32 %v1283_v15, %v1283_v15 }
 0x1a9   : > { %v1403_v57 = vadd.f32 %v1402_v16, %v1340_v54  ;;  %v1286_v54 = vsub.f32 %v2904_v24, %v2595_v62  ;;  %v1348_v16 = vmul.f32 %v1284_v52, %v1284_v52  ;;  %v1355_v52 = vmul.f32 %v2599_v17, %v2599_v17 }
 0x1aa   : > { %v1359_v24 = vmul.f32 %v2615_v28, %v2615_v28  ;;  %v1360_v17 = vmul.f32 %v2619_v58, %v2619_v58  ;;  %v1364_v28 = vmul.f32 %v2635_v10, %v2635_v10  ;;  %v1365_v58 = vmul.f32 %v2639_v3, %v2639_v3 }
 0x1ab   : > { %v1404_v42 = vadd.f32 %v1403_v57, %v1341_v34  ;;  %v1287_v34 = vsub.f32 %v2905_v31, %v2595_v62  ;;  %v1349_v57 = vmul.f32 %v1285_v36, %v1285_v36  ;;  %v1357_v36 = vmul.f32 %v2607_v1, %v2607_v1 }
 0x1ac   : > { %v1362_v1 = vmul.f32 %v2627_v55, %v2627_v55  ;;  %v1367_v55 = vmul.f32 %v2647_v20, %v2647_v20  ;;  %v1369_v10 = vmul.f32 %v2655_v19, %v2655_v19  ;;  %v1370_v3 = vmul.f32 %v2659_v23, %v2659_v23 }
 0x1ad   : > { %v1405_v60 = vadd.f32 %v1404_v42, %v1342_v37  ;;  %v1288_v37 = vsub.f32 %v2906_v21, %v2595_v62  ;;  %v1350_v42 = vmul.f32 %v1286_v54, %v1286_v54  ;;  %v1372_v20 = vmul.f32 %v2667_v50, %v2667_v50 }
 0x1ae   : > { %v1374_v19 = vmul.f32 %v2675_v46, %v2675_v46  ;;  %v1375_v23 = vmul.f32 %v2679_v9, %v2679_v9  ;;  %v1377_v50 = vmul.f32 %v2687_v6, %v2687_v6  ;;  %v1379_v46 = vmul.f32 %v2695_v49, %v2695_v49 }
 0x1af   : > { %v1406_v43 = vadd.f32 %v1405_v60, %v1343_v30  ;;  %v1289_v30 = vsub.f32 %v2907_v33, %v2595_v62  ;;  %v1351_v60 = vmul.f32 %v1287_v34, %v1287_v34  ;;  %v1380_v9 = vmul.f32 %v2699_v2, %v2699_v2 }
 0x1b0   : > { %v1382_v6 = vmul.f32 %v2707_v61, %v2707_v61  ;;  %v1384_v49 = vmul.f32 %v2715_v0, %v2715_v0  ;;  %v1385_v2 = vmul.f32 %v2719_v59, %v2719_v59 }
 0x1b1   : > { %v1407_v47 = vadd.f32 %v1406_v43, %v1344_v8  ;;  %v1290_v8 = vsub.f32 %v2908_v35, %v2595_v62  ;;  %v1352_v43 = vmul.f32 %v1288_v37, %v1288_v37  ;;  %v1353_v15 = vmul.f32 %v1289_v30, %v1289_v30 }
 0x1b2   : > { %v1358_v62 = vmul.f32 %v2611_v48, %v2611_v48  ;;  %v1363_v48 = vmul.f32 %v2631_v4, %v2631_v4  ;;  %v1368_v4 = vmul.f32 %v2651_v26, %v2651_v26  ;;  %v1373_v26 = vmul.f32 %v2671_v39, %v2671_v39 }
 0x1b3   : > { %v1408_v41 = vadd.f32 %v1407_v47, %v1345_v22  ;;  %v1354_v47 = vmul.f32 %v1290_v8, %v1290_v8  ;;  %v1378_v39 = vmul.f32 %v2691_v14, %v2691_v14  ;;  %v1383_v14 = vmul.f32 %v2711_v25, %v2711_v25 }
 0x1b5   : > { %v1409_v45 = vadd.f32 %v1408_v41, %v1346_v27  ;;  %v1356_v41 = vmul.f32 %v2603_v11, %v2603_v11  ;;  %v1361_v11 = vmul.f32 %v2623_v51, %v2623_v51  ;;  %v1366_v51 = vmul.f32 %v2643_v7, %v2643_v7 }
 0x1b6   : > { %v1371_v7 = vmul.f32 %v2663_v40, %v2663_v40  ;;  %v1376_v40 = vmul.f32 %v2683_v18, %v2683_v18  ;;  %v1381_v18 = vmul.f32 %v2703_v44, %v2703_v44 }
 0x1b7   : > { %v1410_v56 = vadd.f32 %v1409_v45, %v1347_v29 }
 0x1b9   : > { %v1411_v63 = vadd.f32 %v1410_v56, %v1348_v16 }
 0x1bb   : > { %v1412_v53 = vadd.f32 %v1411_v63, %v1349_v57 }
 0x1bd   : > { %v1413_v13 = vadd.f32 %v1412_v53, %v1350_v42 }
 0x1bf   : > { %v1414_v38 = vadd.f32 %v1413_v13, %v1351_v60 }
 0x1c1   : > { %v1415_v22 = vadd.f32 %v1414_v38, %v1352_v43 }
 0x1c3   : > { %v1416_v5 = vadd.f32 %v1415_v22, %v1353_v15 }
 0x1c5   : > { %v1417_v27 = vadd.f32 %v1416_v5, %v1354_v47 }
 0x1c7   : > { %v1418_v12 = vadd.f32 %v1417_v27, %v1355_v52 }
 0x1c9   : > { %v1419_v29 = vadd.f32 %v1418_v12, %v1356_v41 }
 0x1cb   : > { %v1420_v45 = vadd.f32 %v1419_v29, %v1357_v36 }
 0x1cd   : > { %v1421_v54 = vadd.f32 %v1420_v45, %v1358_v62 }
 0x1cf   : > { %v1422_v16 = vadd.f32 %v1421_v54, %v1359_v24 }
 0x1d1   : > { %v1423_v56 = vadd.f32 %v1422_v16, %v1360_v17 }
 0x1d3   : > { %v1424_v31 = vadd.f32 %v1423_v56, %v1361_v11 }
 0x1d5   : > { %v1425_v34 = vadd.f32 %v1424_v31, %v1362_v1 }
 0x1d7   : > { %v1426_v57 = vadd.f32 %v1425_v34, %v1363_v48 }
 0x1d9   : > { %v1427_v63 = vadd.f32 %v1426_v57, %v1364_v28 }
 0x1db   : > { %v1428_v21 = vadd.f32 %v1427_v63, %v1365_v58 }
 0x1dd   : > { %v1429_v37 = vadd.f32 %v1428_v21, %v1366_v51 }
 0x1df   : > { %v1430_v42 = vadd.f32 %v1429_v37, %v1367_v55 }
 0x1e1   : > { %v1431_v53 = vadd.f32 %v1430_v42, %v1368_v4 }
 0x1e3   : > { %v1432_v33 = vadd.f32 %v1431_v53, %v1369_v10 }
 0x1e5   : > { %v1433_v30 = vadd.f32 %v1432_v33, %v1370_v3 }
 0x1e7   : > { %v1434_v60 = vadd.f32 %v1433_v30, %v1371_v7 }
 0x1e9   : > { %v1435_v13 = vadd.f32 %v1434_v60, %v1372_v20 }
 0x1eb   : > { %v1436_v35 = vadd.f32 %v1435_v13, %v1373_v26 }
 0x1ed   : > { %v1437_v8 = vadd.f32 %v1436_v35, %v1374_v19 }
 0x1ef   : > { %v1438_v43 = vadd.f32 %v1437_v8, %v1375_v23 }
 0x1f1   : > { %v1439_v38 = vadd.f32 %v1438_v43, %v1376_v40 }
 0x1f3   : > { %v1440_v15 = vadd.f32 %v1439_v38, %v1377_v50 }
 0x1f5   : > { %v1441_v22 = vadd.f32 %v1440_v15, %v1378_v39 }
 0x1f7   : > { %v1442_v47 = vadd.f32 %v1441_v22, %v1379_v46 }
 0x1f9   : > { %v1443_v5 = vadd.f32 %v1442_v47, %v1380_v9 }
 0x1fb   : > { %v1444_v52 = vadd.f32 %v1443_v5, %v1381_v18 }
 0x1fd   : > { %v1445_v27 = vadd.f32 %v1444_v52, %v1382_v6 }
 0x1ff   : > { %v1446_v41 = vadd.f32 %v1445_v27, %v1383_v14 }
 0x201   : > { %v1447_v12 = vadd.f32 %v1446_v41, %v1384_v49 }
 0x203   : > { %v1448_v36 = vadd.f32 %v1447_v12, %v1385_v2 }
 0x205   : > { %v1449_v29 = vrot.slane %v1448_v36, 4 }
 0x207   : > { %v1450_v44 = vadd.f32 %v1449_v29, %v1448_v36 }
 0x209   : > { %v1451_v62 = vrot.slane %v1450_v44, 2 }
 0x20b   : > { %v1452_v45 = vadd.f32 %v1451_v62, %v1450_v44 }
 0x20d   : > { %v1453_v61 = vrot.slane %v1452_v45, 1 }
 0x20f   : > { %v1454_v25 = vadd.f32 %v1453_v61, %v1452_v45 }
 0x211   : > { %v1456_v0 = vsel %vm1455_vm1, %v2592_v32, %v1454_v25 }
 0x212   : > { %1457 = vst [vmem:[%s248_s30] sm:$0x3] %v1456_v0 }
 0x213 PF: > { %s14_s14 = sadd.s32 1, %s2179_s14   ;;  %s2909_s12 = smov %s2175_s13 }
 0x214   : > { %p11_p5 = scmp.ge.s32.totalorder %s14_s14, 6   ;;  %s2910_s13 = smov %s2912_s15 }
 0x216   :  { %13 = sbr.rel (!%p11_p5) target bundleno = 2 (0x2), region = 73 }

// kernel: upconv_forward.3
= control target key start
LH: loop header
LB: loop body
LE: loop exit
PB: predicated region body
PF: predicated region fallthrough
CT: control target
= control target key end

     0   :  { %s937_s12 = smov 0   ;;  %s939_s13 = smov 0   ;;  %s1212_s0 = inlined_call_operand.vmem [shape: bf16[4,512,128], index: 0, kind: input, shape index: {}]   ;;  %s1213_s1 = inlined_call_operand.vmem [shape: f32[1,128], index: 1, kind: input, shape index: {}]   ;;  %s1214_s2 = inlined_call_operand.vmem [shape: f32[1,128], index: 2, kind: input, shape index: {}]   ;;  %s1215_s3 = inlined_call_operand.vmem [shape: f32[4,512,128], index: 3, kind: output, shape index: {}]  }
   0x1   :  { %s941_s14 = smov 0  }
   0x2 LB: > { %s25_s15 = sadd.s32 1, %s911_s13  ;;  %p699_p0 = scmp.ge.s32.totalorder %s915_s14, 1  ;;  %s915_s14 = sphi %s941_s14, %s13_s14   ;;  %s911_s13 = sphi %s939_s13, %s1217_s13   ;;  %s907_s12 = sphi %s937_s12, %s1216_s12  }
   0x3   : > { %p27_p1 = scmp.ge.s32.totalorder %s25_s15, 4  ;;  %p158_p2 = scmp.lt.s32.totalorder %s915_s14, 5 }
   0x5   : > { %s1219_s15 = smov (%p27_p1, %s25_s15), 0  ;;  %p159_p3 = pnand %p699_p0, %p158_p2 }
   0x6   : > { %p191_p4 = scmp.lt.s32.totalorder (!%p159_p3), %s907_s12, 3  ;;  %v966_v0 = vld [vmem:[%s1213_s1] ss:$0 sm:$0xff] (!%p159_p3) }
   0x7   : > { %162 = sbr.rel (%p159_p3) target bundleno = 86 (0x56), region = 32  ;;  %v975_v9 = vld [vmem:[%s1214_s2] ss:$0 sm:$0xff] (!%p159_p3) }
   0xe   : > { %s1221_s12 = smov (!%p191_p4, %s907_s12), 3 }
   0xf   : > { %s708_s16 = sshll.u32 %s1221_s12, 8  ;;  %s709_s24 = sshll.u32 %s1221_s12, 9 }
  0x10   : > { %s961_s19 = scalar_lea.vmem %s1212_s0, %s708_s16  ;;  %s993_s27 = scalar_lea.vmem %s1215_s3, %s709_s24 }
  0x11   : > { %v711_v1 = vld [vmem:[%s961_s19] sm:$0xff]   ;;  %v838_v2 = vld [vmem:[%s961_s19 + $0x8] sm:$0xff]   ;;  %v839_v3 = vld [vmem:[%s961_s19 + $0x10] sm:$0xff]  }
  0x12   : > { %v712_v4 = vunpack.c.l.bf16 %v711_v1  ;;  %v713_v5 = vunpack.c.h.bf16 %v711_v1  ;;  %v716_v6 = vunpack.c.l.bf16 %v838_v2  ;;  %v717_v7 = vunpack.c.h.bf16 %v838_v2  ;;  %v840_v8 = vld [vmem:[%s961_s19 + $0x18] sm:$0xff]   ;;  %v841_v30 = vld [vmem:[%s961_s19 + $0x20] sm:$0xff]   ;;  %v842_v31 = vld [vmem:[%s961_s19 + $0x28] sm:$0xff]  }
  0x13   : > { %v720_v10 = vunpack.c.l.bf16 %v839_v3  ;;  %v721_v11 = vunpack.c.h.bf16 %v839_v3  ;;  %v724_v12 = vunpack.c.l.bf16 %v840_v8  ;;  %v725_v13 = vunpack.c.h.bf16 %v840_v8  ;;  %v843_v36 = vld [vmem:[%s961_s19 + $0x30] sm:$0xff]   ;;  %v844_v37 = vld [vmem:[%s961_s19 + $0x38] sm:$0xff]   ;;  %v845_v3 = vld [vmem:[%s961_s19 + $0x40] sm:$0xff]  }
  0x14   : > { %v345_v14 = vmul.f32 %v712_v4, %v966_v0  ;;  %v346_v15 = vmul.f32 %v713_v5, %v966_v0  ;;  %v347_v16 = vmul.f32 %v716_v6, %v966_v0  ;;  %v348_v17 = vmul.f32 %v717_v7, %v966_v0  ;;  %v846_v4 = vld [vmem:[%s961_s19 + $0x48] sm:$0xff]  }
  0x15   : > { %v349_v18 = vmul.f32 %v720_v10, %v966_v0  ;;  %v350_v19 = vmul.f32 %v721_v11, %v966_v0  ;;  %v351_v20 = vmul.f32 %v724_v12, %v966_v0  ;;  %v352_v21 = vmul.f32 %v725_v13, %v966_v0  ;;  %v847_v10 = vld [vmem:[%s961_s19 + $0x50] sm:$0xff]   ;;  %v848_v11 = vld [vmem:[%s961_s19 + $0x58] sm:$0xff]  }
  0x16   : > { %v416_v22 = vadd.f32 %v975_v9, %v345_v14  ;;  %v417_v23 = vadd.f32 %v975_v9, %v346_v15  ;;  %v418_v24 = vadd.f32 %v975_v9, %v347_v16  ;;  %v419_v25 = vadd.f32 %v975_v9, %v348_v17 }
  0x17   : > { %v420_v26 = vadd.f32 %v975_v9, %v349_v18  ;;  %v421_v27 = vadd.f32 %v975_v9, %v350_v19  ;;  %v422_v28 = vadd.f32 %v975_v9, %v351_v20  ;;  %v423_v29 = vadd.f32 %v975_v9, %v352_v21 }
  0x18   : > { %v480_v32 = vmax.f32 %v416_v22, 0.0  ;;  %v481_v33 = vmax.f32 %v417_v23, 0.0  ;;  %v482_v34 = vmax.f32 %v418_v24, 0.0  ;;  %v483_v35 = vmax.f32 %v419_v25, 0.0 }
  0x19   : > { %v484_v38 = vmax.f32 %v420_v26, 0.0  ;;  %v485_v39 = vmax.f32 %v421_v27, 0.0  ;;  %v486_v40 = vmax.f32 %v422_v28, 0.0  ;;  %v487_v41 = vmax.f32 %v423_v29, 0.0 }
  0x1a   : > { %544 = vst [vmem:[%s993_s27] sm:$0xff] %v480_v32  ;;  %545 = vst [vmem:[%s993_s27 + $0x8] sm:$0xff] %v481_v33  ;;  %v728_v42 = vunpack.c.l.bf16 %v841_v30  ;;  %v729_v43 = vunpack.c.h.bf16 %v841_v30  ;;  %v732_v44 = vunpack.c.l.bf16 %v842_v31  ;;  %v733_v45 = vunpack.c.h.bf16 %v842_v31 }
  0x1b   : > { %546 = vst [vmem:[%s993_s27 + $0x10] sm:$0xff] %v482_v34  ;;  %547 = vst [vmem:[%s993_s27 + $0x18] sm:$0xff] %v483_v35  ;;  %v736_v46 = vunpack.c.l.bf16 %v843_v36  ;;  %v737_v47 = vunpack.c.h.bf16 %v843_v36  ;;  %v740_v48 = vunpack.c.l.bf16 %v844_v37  ;;  %v741_v49 = vunpack.c.h.bf16 %v844_v37 }
  0x1c   : > { %548 = vst [vmem:[%s993_s27 + $0x20] sm:$0xff] %v484_v38  ;;  %549 = vst [vmem:[%s993_s27 + $0x28] sm:$0xff] %v485_v39  ;;  %v353_v50 = vmul.f32 %v728_v42, %v966_v0  ;;  %v354_v51 = vmul.f32 %v729_v43, %v966_v0  ;;  %v355_v52 = vmul.f32 %v732_v44, %v966_v0  ;;  %v744_v16 = vunpack.c.l.bf16 %v845_v3 }
  0x1d   : > { %550 = vst [vmem:[%s993_s27 + $0x30] sm:$0xff] %v486_v40  ;;  %551 = vst [vmem:[%s993_s27 + $0x38] sm:$0xff] %v487_v41  ;;  %v356_v53 = vmul.f32 %v733_v45, %v966_v0  ;;  %v357_v54 = vmul.f32 %v736_v46, %v966_v0  ;;  %v358_v55 = vmul.f32 %v737_v47, %v966_v0  ;;  %v745_v17 = vunpack.c.h.bf16 %v845_v3  ;;  %v849_v40 = vld [vmem:[%s961_s19 + $0x60] sm:$0xff]   ;;  %v850_v41 = vld [vmem:[%s961_s19 + $0x68] sm:$0xff]  }
  0x1e   : > { %v359_v56 = vmul.f32 %v740_v48, %v966_v0  ;;  %v360_v57 = vmul.f32 %v741_v49, %v966_v0  ;;  %v424_v58 = vadd.f32 %v975_v9, %v353_v50  ;;  %v425_v59 = vadd.f32 %v975_v9, %v354_v51  ;;  %v851_v46 = vld [vmem:[%s961_s19 + $0x70] sm:$0xff]   ;;  %v852_v47 = vld [vmem:[%s961_s19 + $0x78] sm:$0xff]  }
  0x1f   : > { %v426_v60 = vadd.f32 %v975_v9, %v355_v52  ;;  %v427_v61 = vadd.f32 %v975_v9, %v356_v53  ;;  %v428_v62 = vadd.f32 %v975_v9, %v357_v54  ;;  %v429_v63 = vadd.f32 %v975_v9, %v358_v55 }
  0x20   : > { %v430_v1 = vadd.f32 %v975_v9, %v359_v56  ;;  %v431_v2 = vadd.f32 %v975_v9, %v360_v57  ;;  %v488_v5 = vmax.f32 %v424_v58, 0.0  ;;  %v489_v6 = vmax.f32 %v425_v59, 0.0 }
  0x21   : > { %v490_v7 = vmax.f32 %v426_v60, 0.0  ;;  %v491_v8 = vmax.f32 %v427_v61, 0.0  ;;  %v492_v12 = vmax.f32 %v428_v62, 0.0  ;;  %v493_v13 = vmax.f32 %v429_v63, 0.0 }
  0x22   : > { %v494_v14 = vmax.f32 %v430_v1, 0.0  ;;  %v495_v15 = vmax.f32 %v431_v2, 0.0  ;;  %552 = vst [vmem:[%s993_s27 + $0x40] sm:$0xff] %v488_v5  ;;  %553 = vst [vmem:[%s993_s27 + $0x48] sm:$0xff] %v489_v6  ;;  %v748_v18 = vunpack.c.l.bf16 %v846_v4  ;;  %v749_v19 = vunpack.c.h.bf16 %v846_v4 }
  0x23   : > { %554 = vst [vmem:[%s993_s27 + $0x50] sm:$0xff] %v490_v7  ;;  %555 = vst [vmem:[%s993_s27 + $0x58] sm:$0xff] %v491_v8  ;;  %v752_v20 = vunpack.c.l.bf16 %v847_v10  ;;  %v753_v21 = vunpack.c.h.bf16 %v847_v10  ;;  %v756_v22 = vunpack.c.l.bf16 %v848_v11  ;;  %v757_v23 = vunpack.c.h.bf16 %v848_v11 }
  0x24   : > { %556 = vst [vmem:[%s993_s27 + $0x60] sm:$0xff] %v492_v12  ;;  %557 = vst [vmem:[%s993_s27 + $0x68] sm:$0xff] %v493_v13  ;;  %v361_v24 = vmul.f32 %v744_v16, %v966_v0  ;;  %v362_v25 = vmul.f32 %v745_v17, %v966_v0  ;;  %v363_v26 = vmul.f32 %v748_v18, %v966_v0  ;;  %v760_v52 = vunpack.c.l.bf16 %v849_v40 }
  0x25   : > { %558 = vst [vmem:[%s993_s27 + $0x70] sm:$0xff] %v494_v14  ;;  %559 = vst [vmem:[%s993_s27 + $0x78] sm:$0xff] %v495_v15  ;;  %v364_v27 = vmul.f32 %v749_v19, %v966_v0  ;;  %v365_v28 = vmul.f32 %v752_v20, %v966_v0  ;;  %v366_v29 = vmul.f32 %v753_v21, %v966_v0  ;;  %v761_v53 = vunpack.c.h.bf16 %v849_v40  ;;  %v853_v14 = vld [vmem:[%s961_s19 + $0x80] sm:$0xff]   ;;  %v854_v15 = vld [vmem:[%s961_s19 + $0x88] sm:$0xff]  }
  0x26   : > { %v367_v30 = vmul.f32 %v756_v22, %v966_v0  ;;  %v368_v31 = vmul.f32 %v757_v23, %v966_v0  ;;  %v432_v32 = vadd.f32 %v975_v9, %v361_v24  ;;  %v433_v33 = vadd.f32 %v975_v9, %v362_v25  ;;  %v855_v20 = vld [vmem:[%s961_s19 + $0x90] sm:$0xff]   ;;  %v856_v21 = vld [vmem:[%s961_s19 + $0x98] sm:$0xff]  }
  0x27   : > { %v434_v34 = vadd.f32 %v975_v9, %v363_v26  ;;  %v435_v35 = vadd.f32 %v975_v9, %v364_v27  ;;  %v436_v36 = vadd.f32 %v975_v9, %v365_v28  ;;  %v437_v37 = vadd.f32 %v975_v9, %v366_v29 }
  0x28   : > { %v438_v38 = vadd.f32 %v975_v9, %v367_v30  ;;  %v439_v39 = vadd.f32 %v975_v9, %v368_v31  ;;  %v496_v42 = vmax.f32 %v432_v32, 0.0  ;;  %v497_v43 = vmax.f32 %v433_v33, 0.0 }
  0x29   : > { %v498_v44 = vmax.f32 %v434_v34, 0.0  ;;  %v499_v45 = vmax.f32 %v435_v35, 0.0  ;;  %v500_v48 = vmax.f32 %v436_v36, 0.0  ;;  %v501_v49 = vmax.f32 %v437_v37, 0.0 }
  0x2a   : > { %v502_v50 = vmax.f32 %v438_v38, 0.0  ;;  %v503_v51 = vmax.f32 %v439_v39, 0.0  ;;  %560 = vst [vmem:[%s993_s27 + $0x80] sm:$0xff] %v496_v42  ;;  %561 = vst [vmem:[%s993_s27 + $0x88] sm:$0xff] %v497_v43  ;;  %v764_v54 = vunpack.c.l.bf16 %v850_v41  ;;  %v765_v55 = vunpack.c.h.bf16 %v850_v41 }
  0x2b   : > { %562 = vst [vmem:[%s993_s27 + $0x90] sm:$0xff] %v498_v44  ;;  %563 = vst [vmem:[%s993_s27 + $0x98] sm:$0xff] %v499_v45  ;;  %v768_v56 = vunpack.c.l.bf16 %v851_v46  ;;  %v769_v57 = vunpack.c.h.bf16 %v851_v46  ;;  %v772_v58 = vunpack.c.l.bf16 %v852_v47  ;;  %v773_v59 = vunpack.c.h.bf16 %v852_v47 }
  0x2c   : > { %564 = vst [vmem:[%s993_s27 + $0xa0] sm:$0xff] %v500_v48  ;;  %565 = vst [vmem:[%s993_s27 + $0xa8] sm:$0xff] %v501_v49  ;;  %v369_v60 = vmul.f32 %v760_v52, %v966_v0  ;;  %v370_v61 = vmul.f32 %v761_v53, %v966_v0  ;;  %v371_v62 = vmul.f32 %v764_v54, %v966_v0  ;;  %v776_v26 = vunpack.c.l.bf16 %v853_v14 }
  0x2d   : > { %566 = vst [vmem:[%s993_s27 + $0xb0] sm:$0xff] %v502_v50  ;;  %567 = vst [vmem:[%s993_s27 + $0xb8] sm:$0xff] %v503_v51  ;;  %v372_v63 = vmul.f32 %v765_v55, %v966_v0  ;;  %v373_v1 = vmul.f32 %v768_v56, %v966_v0  ;;  %v374_v2 = vmul.f32 %v769_v57, %v966_v0  ;;  %v777_v27 = vunpack.c.h.bf16 %v853_v14  ;;  %v857_v50 = vld [vmem:[%s961_s19 + $0xa0] sm:$0xff]   ;;  %v858_v51 = vld [vmem:[%s961_s19 + $0xa8] sm:$0xff]  }
  0x2e   : > { %v375_v3 = vmul.f32 %v772_v58, %v966_v0  ;;  %v376_v4 = vmul.f32 %v773_v59, %v966_v0  ;;  %v440_v5 = vadd.f32 %v975_v9, %v369_v60  ;;  %v441_v6 = vadd.f32 %v975_v9, %v370_v61  ;;  %v859_v56 = vld [vmem:[%s961_s19 + $0xb0] sm:$0xff]   ;;  %v860_v57 = vld [vmem:[%s961_s19 + $0xb8] sm:$0xff]  }
  0x2f   : > { %v442_v7 = vadd.f32 %v975_v9, %v371_v62  ;;  %v443_v8 = vadd.f32 %v975_v9, %v372_v63  ;;  %v444_v10 = vadd.f32 %v975_v9, %v373_v1  ;;  %v445_v11 = vadd.f32 %v975_v9, %v374_v2 }
  0x30   : > { %v446_v12 = vadd.f32 %v975_v9, %v375_v3  ;;  %v447_v13 = vadd.f32 %v975_v9, %v376_v4  ;;  %v504_v16 = vmax.f32 %v440_v5, 0.0  ;;  %v505_v17 = vmax.f32 %v441_v6, 0.0 }
  0x31   : > { %v506_v18 = vmax.f32 %v442_v7, 0.0  ;;  %v507_v19 = vmax.f32 %v443_v8, 0.0  ;;  %v508_v22 = vmax.f32 %v444_v10, 0.0  ;;  %v509_v23 = vmax.f32 %v445_v11, 0.0 }
  0x32   : > { %v510_v24 = vmax.f32 %v446_v12, 0.0  ;;  %v511_v25 = vmax.f32 %v447_v13, 0.0  ;;  %568 = vst [vmem:[%s993_s27 + $0xc0] sm:$0xff] %v504_v16  ;;  %569 = vst [vmem:[%s993_s27 + $0xc8] sm:$0xff] %v505_v17  ;;  %v780_v28 = vunpack.c.l.bf16 %v854_v15  ;;  %v781_v29 = vunpack.c.h.bf16 %v854_v15 }
  0x33   : > { %570 = vst [vmem:[%s993_s27 + $0xd0] sm:$0xff] %v506_v18  ;;  %571 = vst [vmem:[%s993_s27 + $0xd8] sm:$0xff] %v507_v19  ;;  %v784_v30 = vunpack.c.l.bf16 %v855_v20  ;;  %v785_v31 = vunpack.c.h.bf16 %v855_v20  ;;  %v788_v32 = vunpack.c.l.bf16 %v856_v21  ;;  %v789_v33 = vunpack.c.h.bf16 %v856_v21 }
  0x34   : > { %572 = vst [vmem:[%s993_s27 + $0xe0] sm:$0xff] %v508_v22  ;;  %573 = vst [vmem:[%s993_s27 + $0xe8] sm:$0xff] %v509_v23  ;;  %v377_v34 = vmul.f32 %v776_v26, %v966_v0  ;;  %v378_v35 = vmul.f32 %v777_v27, %v966_v0  ;;  %v379_v36 = vmul.f32 %v780_v28, %v966_v0  ;;  %v792_v62 = vunpack.c.l.bf16 %v857_v50 }
  0x35   : > { %574 = vst [vmem:[%s993_s27 + $0xf0] sm:$0xff] %v510_v24  ;;  %575 = vst [vmem:[%s993_s27 + $0xf8] sm:$0xff] %v511_v25  ;;  %v380_v37 = vmul.f32 %v781_v29, %v966_v0  ;;  %v381_v38 = vmul.f32 %v784_v30, %v966_v0  ;;  %v382_v39 = vmul.f32 %v785_v31, %v966_v0  ;;  %v793_v63 = vunpack.c.h.bf16 %v857_v50  ;;  %v861_v24 = vld [vmem:[%s961_s19 + $0xc0] sm:$0xff]   ;;  %v862_v25 = vld [vmem:[%s961_s19 + $0xc8] sm:$0xff]  }
  0x36   : > { %v383_v40 = vmul.f32 %v788_v32, %v966_v0  ;;  %v384_v41 = vmul.f32 %v789_v33, %v966_v0  ;;  %v448_v42 = vadd.f32 %v975_v9, %v377_v34  ;;  %v449_v43 = vadd.f32 %v975_v9, %v378_v35  ;;  %v863_v30 = vld [vmem:[%s961_s19 + $0xd0] sm:$0xff]   ;;  %v864_v31 = vld [vmem:[%s961_s19 + $0xd8] sm:$0xff]  }
  0x37   : > { %v450_v44 = vadd.f32 %v975_v9, %v379_v36  ;;  %v451_v45 = vadd.f32 %v975_v9, %v380_v37  ;;  %v452_v46 = vadd.f32 %v975_v9, %v381_v38  ;;  %v453_v47 = vadd.f32 %v975_v9, %v382_v39 }
  0x38   : > { %v454_v48 = vadd.f32 %v975_v9, %v383_v40  ;;  %v455_v49 = vadd.f32 %v975_v9, %v384_v41  ;;  %v512_v52 = vmax.f32 %v448_v42, 0.0  ;;  %v513_v53 = vmax.f32 %v449_v43, 0.0 }
  0x39   : > { %v514_v54 = vmax.f32 %v450_v44, 0.0  ;;  %v515_v55 = vmax.f32 %v451_v45, 0.0  ;;  %v516_v58 = vmax.f32 %v452_v46, 0.0  ;;  %v517_v59 = vmax.f32 %v453_v47, 0.0 }
  0x3a   : > { %v518_v60 = vmax.f32 %v454_v48, 0.0  ;;  %v519_v61 = vmax.f32 %v455_v49, 0.0  ;;  %576 = vst [vmem:[%s993_s27 + $0x100] sm:$0xff] %v512_v52  ;;  %577 = vst [vmem:[%s993_s27 + $0x108] sm:$0xff] %v513_v53  ;;  %v796_v1 = vunpack.c.l.bf16 %v858_v51  ;;  %v797_v2 = vunpack.c.h.bf16 %v858_v51 }
  0x3b   : > { %578 = vst [vmem:[%s993_s27 + $0x110] sm:$0xff] %v514_v54  ;;  %579 = vst [vmem:[%s993_s27 + $0x118] sm:$0xff] %v515_v55  ;;  %v800_v3 = vunpack.c.l.bf16 %v859_v56  ;;  %v801_v4 = vunpack.c.h.bf16 %v859_v56  ;;  %v804_v5 = vunpack.c.l.bf16 %v860_v57  ;;  %v805_v6 = vunpack.c.h.bf16 %v860_v57 }
  0x3c   : > { %580 = vst [vmem:[%s993_s27 + $0x120] sm:$0xff] %v516_v58  ;;  %581 = vst [vmem:[%s993_s27 + $0x128] sm:$0xff] %v517_v59  ;;  %v385_v7 = vmul.f32 %v792_v62, %v966_v0  ;;  %v386_v8 = vmul.f32 %v793_v63, %v966_v0  ;;  %v387_v10 = vmul.f32 %v796_v1, %v966_v0  ;;  %v808_v36 = vunpack.c.l.bf16 %v861_v24 }
  0x3d   : > { %582 = vst [vmem:[%s993_s27 + $0x130] sm:$0xff] %v518_v60  ;;  %583 = vst [vmem:[%s993_s27 + $0x138] sm:$0xff] %v519_v61  ;;  %v388_v11 = vmul.f32 %v797_v2, %v966_v0  ;;  %v389_v12 = vmul.f32 %v800_v3, %v966_v0  ;;  %v390_v13 = vmul.f32 %v801_v4, %v966_v0  ;;  %v809_v37 = vunpack.c.h.bf16 %v861_v24  ;;  %v865_v60 = vld [vmem:[%s961_s19 + $0xe0] sm:$0xff]   ;;  %v866_v61 = vld [vmem:[%s961_s19 + $0xe8] sm:$0xff]  }
  0x3e   : > { %v391_v14 = vmul.f32 %v804_v5, %v966_v0  ;;  %v392_v15 = vmul.f32 %v805_v6, %v966_v0  ;;  %v456_v16 = vadd.f32 %v975_v9, %v385_v7  ;;  %v457_v17 = vadd.f32 %v975_v9, %v386_v8  ;;  %v867_v3 = vld [vmem:[%s961_s19 + $0xf0] sm:$0xff]   ;;  %v868_v4 = vld [vmem:[%s961_s19 + $0xf8] sm:$0xff]  }
  0x3f   : > { %v458_v18 = vadd.f32 %v975_v9, %v387_v10  ;;  %v459_v19 = vadd.f32 %v975_v9, %v388_v11  ;;  %v460_v20 = vadd.f32 %v975_v9, %v389_v12  ;;  %v461_v21 = vadd.f32 %v975_v9, %v390_v13 }
  0x40   : > { %v462_v22 = vadd.f32 %v975_v9, %v391_v14  ;;  %v463_v23 = vadd.f32 %v975_v9, %v392_v15  ;;  %v520_v26 = vmax.f32 %v456_v16, 0.0  ;;  %v521_v27 = vmax.f32 %v457_v17, 0.0 }
  0x41   : > { %v522_v28 = vmax.f32 %v458_v18, 0.0  ;;  %v523_v29 = vmax.f32 %v459_v19, 0.0  ;;  %v524_v32 = vmax.f32 %v460_v20, 0.0  ;;  %v525_v33 = vmax.f32 %v461_v21, 0.0 }
  0x42   : > { %v526_v34 = vmax.f32 %v462_v22, 0.0  ;;  %v527_v35 = vmax.f32 %v463_v23, 0.0  ;;  %584 = vst [vmem:[%s993_s27 + $0x140] sm:$0xff] %v520_v26  ;;  %585 = vst [vmem:[%s993_s27 + $0x148] sm:$0xff] %v521_v27  ;;  %v812_v38 = vunpack.c.l.bf16 %v862_v25  ;;  %v813_v39 = vunpack.c.h.bf16 %v862_v25 }
  0x43   : > { %586 = vst [vmem:[%s993_s27 + $0x150] sm:$0xff] %v522_v28  ;;  %587 = vst [vmem:[%s993_s27 + $0x158] sm:$0xff] %v523_v29  ;;  %v816_v40 = vunpack.c.l.bf16 %v863_v30  ;;  %v817_v41 = vunpack.c.h.bf16 %v863_v30  ;;  %v820_v42 = vunpack.c.l.bf16 %v864_v31  ;;  %v821_v43 = vunpack.c.h.bf16 %v864_v31 }
  0x44   : > { %588 = vst [vmem:[%s993_s27 + $0x160] sm:$0xff] %v524_v32  ;;  %589 = vst [vmem:[%s993_s27 + $0x168] sm:$0xff] %v525_v33  ;;  %v393_v44 = vmul.f32 %v808_v36, %v966_v0  ;;  %v394_v45 = vmul.f32 %v809_v37, %v966_v0  ;;  %v395_v46 = vmul.f32 %v812_v38, %v966_v0  ;;  %v824_v10 = vunpack.c.l.bf16 %v865_v60 }
  0x45   : > { %590 = vst [vmem:[%s993_s27 + $0x170] sm:$0xff] %v526_v34  ;;  %591 = vst [vmem:[%s993_s27 + $0x178] sm:$0xff] %v527_v35  ;;  %v396_v47 = vmul.f32 %v813_v39, %v966_v0  ;;  %v397_v48 = vmul.f32 %v816_v40, %v966_v0  ;;  %v398_v49 = vmul.f32 %v817_v41, %v966_v0  ;;  %v825_v11 = vunpack.c.h.bf16 %v865_v60 }
  0x46   : > { %v399_v50 = vmul.f32 %v820_v42, %v966_v0  ;;  %v400_v51 = vmul.f32 %v821_v43, %v966_v0  ;;  %v464_v52 = vadd.f32 %v975_v9, %v393_v44  ;;  %v465_v53 = vadd.f32 %v975_v9, %v394_v45 }
  0x47   : > { %v466_v54 = vadd.f32 %v975_v9, %v395_v46  ;;  %v467_v55 = vadd.f32 %v975_v9, %v396_v47  ;;  %v468_v56 = vadd.f32 %v975_v9, %v397_v48  ;;  %v469_v57 = vadd.f32 %v975_v9, %v398_v49 }
  0x48   : > { %v470_v58 = vadd.f32 %v975_v9, %v399_v50  ;;  %v471_v59 = vadd.f32 %v975_v9, %v400_v51  ;;  %v528_v62 = vmax.f32 %v464_v52, 0.0  ;;  %v529_v63 = vmax.f32 %v465_v53, 0.0 }
  0x49   : > { %v530_v1 = vmax.f32 %v466_v54, 0.0  ;;  %v531_v2 = vmax.f32 %v467_v55, 0.0  ;;  %v532_v5 = vmax.f32 %v468_v56, 0.0  ;;  %v533_v6 = vmax.f32 %v469_v57, 0.0 }
  0x4a   : > { %v534_v7 = vmax.f32 %v470_v58, 0.0  ;;  %v535_v8 = vmax.f32 %v471_v59, 0.0  ;;  %592 = vst [vmem:[%s993_s27 + $0x180] sm:$0xff] %v528_v62  ;;  %593 = vst [vmem:[%s993_s27 + $0x188] sm:$0xff] %v529_v63  ;;  %v828_v12 = vunpack.c.l.bf16 %v866_v61  ;;  %v829_v13 = vunpack.c.h.bf16 %v866_v61 }
  0x4b   : > { %594 = vst [vmem:[%s993_s27 + $0x190] sm:$0xff] %v530_v1  ;;  %595 = vst [vmem:[%s993_s27 + $0x198] sm:$0xff] %v531_v2  ;;  %v832_v14 = vunpack.c.l.bf16 %v867_v3  ;;  %v833_v15 = vunpack.c.h.bf16 %v867_v3  ;;  %v836_v16 = vunpack.c.l.bf16 %v868_v4  ;;  %v837_v17 = vunpack.c.h.bf16 %v868_v4 }
  0x4c   : > { %596 = vst [vmem:[%s993_s27 + $0x1a0] sm:$0xff] %v532_v5  ;;  %597 = vst [vmem:[%s993_s27 + $0x1a8] sm:$0xff] %v533_v6  ;;  %v401_v18 = vmul.f32 %v824_v10, %v966_v0  ;;  %v402_v19 = vmul.f32 %v825_v11, %v966_v0  ;;  %v403_v20 = vmul.f32 %v828_v12, %v966_v0 }
  0x4d   : > { %598 = vst [vmem:[%s993_s27 + $0x1b0] sm:$0xff] %v534_v7  ;;  %599 = vst [vmem:[%s993_s27 + $0x1b8] sm:$0xff] %v535_v8  ;;  %v404_v21 = vmul.f32 %v829_v13, %v966_v0  ;;  %v405_v22 = vmul.f32 %v832_v14, %v966_v0  ;;  %v406_v23 = vmul.f32 %v833_v15, %v966_v0 }
  0x4e   : > { %v407_v24 = vmul.f32 %v836_v16, %v966_v0  ;;  %v408_v25 = vmul.f32 %v837_v17, %v966_v0  ;;  %v472_v26 = vadd.f32 %v975_v9, %v401_v18  ;;  %v473_v27 = vadd.f32 %v975_v9, %v402_v19 }
  0x4f   : > { %v474_v28 = vadd.f32 %v975_v9, %v403_v20  ;;  %v475_v29 = vadd.f32 %v975_v9, %v404_v21  ;;  %v476_v30 = vadd.f32 %v975_v9, %v405_v22  ;;  %v477_v31 = vadd.f32 %v975_v9, %v406_v23 }
  0x50   : > { %v478_v0 = vadd.f32 %v975_v9, %v407_v24  ;;  %v479_v32 = vadd.f32 %v975_v9, %v408_v25  ;;  %v536_v33 = vmax.f32 %v472_v26, 0.0  ;;  %v537_v34 = vmax.f32 %v473_v27, 0.0 }
  0x51   : > { %v538_v35 = vmax.f32 %v474_v28, 0.0  ;;  %v539_v36 = vmax.f32 %v475_v29, 0.0  ;;  %v540_v37 = vmax.f32 %v476_v30, 0.0  ;;  %v541_v38 = vmax.f32 %v477_v31, 0.0 }
  0x52   : > { %v542_v39 = vmax.f32 %v478_v0, 0.0  ;;  %v543_v40 = vmax.f32 %v479_v32, 0.0  ;;  %600 = vst [vmem:[%s993_s27 + $0x1c0] sm:$0xff] %v536_v33  ;;  %601 = vst [vmem:[%s993_s27 + $0x1c8] sm:$0xff] %v537_v34 }
  0x53   : > { %602 = vst [vmem:[%s993_s27 + $0x1d0] sm:$0xff] %v538_v35  ;;  %603 = vst [vmem:[%s993_s27 + $0x1d8] sm:$0xff] %v539_v36 }
  0x54   : > { %604 = vst [vmem:[%s993_s27 + $0x1e0] sm:$0xff] %v540_v37  ;;  %605 = vst [vmem:[%s993_s27 + $0x1e8] sm:$0xff] %v541_v38 }
  0x55   : > { %606 = vst [vmem:[%s993_s27 + $0x1f0] sm:$0xff] %v542_v39  ;;  %607 = vst [vmem:[%s993_s27 + $0x1f8] sm:$0xff] %v543_v40 }
  0x56 PF: > { %s13_s14 = sadd.s32 1, %s915_s14   ;;  %s1216_s12 = smov %s911_s13 }
  0x57   : > { %p10_p5 = scmp.ge.s32.totalorder %s13_s14, 6   ;;  %s1217_s13 = smov %s1219_s15 }
  0x59   :  { %12 = sbr.rel (!%p10_p5) target bundleno = 2 (0x2), region = 62 }

</bundles_post_ra>
